<compile_context>
chip_gen: v7x
topology: tpu7x:2x2x1
jax: 0.10.0
libtpu: 0.0.40
codegen_flags: <defaults>
</compile_context>

<pallas_src>
import numpy as np
import jax
import jax.numpy as jnp
from jax import lax
from jax.experimental import pallas as pl
from jax.experimental.pallas import tpu as pltpu


_GATE_NEG_INF = -1e9        # i-gate pre-activation for state-preserving pad steps
_RECURRENCE_UNROLL = 8      # partial unroll of the serial per-step loop (tunable)


# ----------------------------------------------------------------------------
# VMEM-budgeted time-block selection
# ----------------------------------------------------------------------------
def _vmem_budget_bytes():
    """~45% of this chip's VMEM for the recurrence kernel's pipelined blocks."""
    try:
        cap = pltpu.get_tpu_info().vmem_capacity_bytes
    except Exception:
        cap = 64 * 1024 * 1024          # conservative default (v7x per-core VMEM)
    return int(cap * 0.45)


def _choose_time_block(T, B, H, max_block=32):
    """Largest Tb <= max_block whose double-buffered blocks fit the VMEM budget.

    Per grid step we hold 2 directions x 2 pipeline buffers of the (Tb,B,4H)
    f32 gx block and the (Tb,B,H) f32 out block, plus the bf16 W_hh^T weights
    and the resident (2,B,H) state.
    """
    budget = _vmem_budget_bytes()

    def blk_bytes(tb):
        gx = tb * B * 4 * H * 4          # f32 gx block, per direction
        out = tb * B * H * 4             # f32 out block, per direction
        w = H * 4 * H * 2                # bf16 W_hh^T, per direction
        st = 2 * (2 * B * H * 4)         # hN + cN resident state
        return 2 * 2 * (gx + out) + 2 * 2 * w + 2 * st

    tb = max(1, min(T, max_block))
    while tb > 1 and blk_bytes(tb) > budget:
        tb -= 1
    vmem_limit = min(budget + (16 << 20), 100 << 20)
    return tb, vmem_limit


# ----------------------------------------------------------------------------
# Pallas kernel: one bidirectional LSTM layer, Tb timesteps per grid step.
# ----------------------------------------------------------------------------
def _bilstm_layer_kernel(gxf_ref, gxb_ref, whf_ref, whb_ref,
                         outf_ref, outb_ref, hN_ref, cN_ref):
    """gxf/gxb hold x @ W_ih^T + (b_ih + b_hh) (gate order i,f,o,g).

    Forward consumes time-block `tb`; backward consumes block `nblk-1-tb`
    and walks it in reverse.  hN_ref / cN_ref are the resident recurrent
    state (constant block index across the grid) and end up holding the
    final (h_n, c_n) for this layer, ordered [fwd, bwd].
    """
    tb = pl.program_id(0)
    Tb = gxf_ref.shape[0]
    H = whf_ref.shape[0]

    @pl.when(tb == 0)
    def _():
        hN_ref[...] = jnp.zeros_like(hN_ref)
        cN_ref[...] = jnp.zeros_like(cN_ref)

    w_f = whf_ref[...]          # (H, 4H) bf16, loaded once per grid step
    w_b = whb_ref[...]

    def cell(gates, c_prev):
        # Gate order (i, f, o, g): one sigmoid over 3H lanes + one tanh over
        # H lanes (batched EUP transcendentals instead of 3 separate sigmoids).
        sig = jax.nn.sigmoid(gates[:, :3 * H])
        g_g = jnp.tanh(gates[:, 3 * H:])
        i_g = sig[:, 0 * H:1 * H]
        f_g = sig[:, 1 * H:2 * H]
        o_g = sig[:, 2 * H:3 * H]
        c_new = f_g * c_prev + i_g * g_g
        h_new = o_g * jnp.tanh(c_new)
        return h_new, c_new

    def step(i, carry):
        h_f, c_f, h_b, c_b = carry
        # bf16 x bf16 MXU matmul, f32 accumulate; gates/c stay f32.
        g_f = gxf_ref[i] + jnp.dot(h_f.astype(jnp.bfloat16), w_f,
                                   preferred_element_type=jnp.float32)
        g_b = gxb_ref[Tb - 1 - i] + jnp.dot(h_b.astype(jnp.bfloat16), w_b,
                                            preferred_element_type=jnp.float32)
        h_f, c_f = cell(g_f, c_f)
        h_b, c_b = cell(g_b, c_b)
        outf_ref[i] = h_f
        outb_ref[Tb - 1 - i] = h_b
        return (h_f, c_f, h_b, c_b)

    carry0 = (hN_ref[0], cN_ref[0], hN_ref[1], cN_ref[1])
    h_f, c_f, h_b, c_b = lax.fori_loop(0, Tb, step, carry0,
                                       unroll=min(Tb, _RECURRENCE_UNROLL))

    hN_ref[0] = h_f
    cN_ref[0] = c_f
    hN_ref[1] = h_b
    cN_ref[1] = c_b


def bilstm_layer(gx_fwd, gx_bwd, whh_fwd_t, whh_bwd_t, *, Tb, vmem_limit):
    """gx_*: (T, B, 4H) f32 precomputed input gates; whh_*_t: (H, 4H) bf16."""
    T, B, G = gx_fwd.shape
    H = whh_fwd_t.shape[0]
    nblk = T // Tb

    outf, outb, hN, cN = pl.pallas_call(
        _bilstm_layer_kernel,
        out_shape=(jax.ShapeDtypeStruct((T, B, H), jnp.float32),
                   jax.ShapeDtypeStruct((T, B, H), jnp.float32),
                   jax.ShapeDtypeStruct((2, B, H), jnp.float32),
                   jax.ShapeDtypeStruct((2, B, H), jnp.float32)),
        grid_spec=pltpu.PrefetchScalarGridSpec(
            num_scalar_prefetch=0,
            grid=(nblk,),
            in_specs=[
                pl.BlockSpec((Tb, B, G), lambda t: (t, 0, 0)),
                pl.BlockSpec((Tb, B, G), lambda t: (nblk - 1 - t, 0, 0)),
                pl.BlockSpec((H, G), lambda t: (0, 0)),
                pl.BlockSpec((H, G), lambda t: (0, 0)),
            ],
            out_specs=[
                pl.BlockSpec((Tb, B, H), lambda t: (t, 0, 0)),
                pl.BlockSpec((Tb, B, H), lambda t: (nblk - 1 - t, 0, 0)),
                pl.BlockSpec((2, B, H), lambda t: (0, 0, 0)),
                pl.BlockSpec((2, B, H), lambda t: (0, 0, 0)),
            ],
        ),
        compiler_params=pltpu.CompilerParams(
            dimension_semantics=("arbitrary",),      # recurrence across blocks
            vmem_limit_bytes=vmem_limit),
    )(gx_fwd, gx_bwd, whh_fwd_t, whh_bwd_t)
    return outf, outb, hN, cN


# ----------------------------------------------------------------------------
# Hoisted input projection (plain XLA, fused under jit). The feature chunks in
# x_parts concatenate to the layer's input size, avoiding an inter-layer
# concat in HBM (the fwd/bwd halves are projected separately).
# ----------------------------------------------------------------------------
def _input_gates(x_parts, w_ih_t, bias):
    off = 0
    g = None
    for xp in x_parts:
        f = xp.shape[-1]
        part = jnp.einsum('tbi,ig->tbg', xp, w_ih_t[off:off + f, :],
                          preferred_element_type=jnp.float32)
        g = part if g is None else g + part
        off += f
    return g + bias.reshape(1, 1, -1)


def _reorder_gates(a, axis=0):
    """PyTorch gate order (i, f, g, o) -> kernel order (i, f, o, g)."""
    i, f, g, o = jnp.split(a, 4, axis=axis)
    return jnp.concatenate([i, f, o, g], axis=axis)


# ----------------------------------------------------------------------------
# Parameter init (deterministic, PyTorch-style uniform(-1/sqrt(H), 1/sqrt(H)))
# ----------------------------------------------------------------------------
def init_encoder_params(key, n_feats, hidden_size, num_layers):
    bound = 1.0 / float(hidden_size) ** 0.5
    params = []
    for layer in range(num_layers):
        layer_in = n_feats if layer == 0 else 2 * hidden_size
        dir_params = []
        for _d in range(2):
            key, k1, k2, k3, k4 = jax.random.split(key, 5)
            w_ih = jax.random.uniform(k1, (4 * hidden_size, layer_in),
                                      jnp.float32, -bound, bound)
            w_hh = jax.random.uniform(k2, (4 * hidden_size, hidden_size),
                                      jnp.float32, -bound, bound)
            b_ih = jax.random.uniform(k3, (4 * hidden_size,),
                                      jnp.float32, -bound, bound)
            b_hh = jax.random.uniform(k4, (4 * hidden_size,),
                                      jnp.float32, -bound, bound)
            dir_params.append((w_ih, w_hh, b_ih, b_hh))
        params.append(dir_params)
    return params


# ----------------------------------------------------------------------------
# Encoder forward (jit'ed: all glue ops fuse; only the recurrence is Pallas)
# ----------------------------------------------------------------------------
@jax.jit
def encoder_forward(params, x):
    T, B, _ = x.shape
    H = params[0][0][1].shape[1]                 # W_hh: (4H, H)
    Tb, vmem_limit = _choose_time_block(T, B, H)
    P = (-T) % Tb                                # pad so Tb | padded length

    h_list, c_list = [], []
    inputs = [x]                                  # feature chunks (no HBM concat)
    outf = outb = None
    for layer_params in params:
        (wif, whf, bif, bhf), (wib, whb, bib, bhb) = layer_params
        # Weight prep (fused by jit): gate reorder, transpose, fold biases,
        # bf16 W_hh^T for the MXU recurrence matmul.
        wif_t = jnp.transpose(_reorder_gates(wif))
        wib_t = jnp.transpose(_reorder_gates(wib))
        whf_t = jnp.transpose(_reorder_gates(whf)).astype(jnp.bfloat16)
        whb_t = jnp.transpose(_reorder_gates(whb)).astype(jnp.bfloat16)
        bias_f = _reorder_gates(bif + bhf)
        bias_b = _reorder_gates(bib + bhb)

        gx_fwd = _input_gates(inputs, wif_t, bias_f)     # (T, B, 4H) f32
        gx_bwd = _input_gates(inputs, wib_t, bias_b)
        if P:
            # State-preserving pad steps: i-gate pre-act = -inf keeps h = c = 0,
            # so final (h_n, c_n) and the real-time outputs are unaffected.
            pad = jnp.concatenate(
                [jnp.full((P, B, H), _GATE_NEG_INF, jnp.float32),
                 jnp.zeros((P, B, 3 * H), jnp.float32)], axis=-1)
            gx_fwd = jnp.concatenate([pad, gx_fwd], axis=0)   # fwd: left pad
            gx_bwd = jnp.concatenate([gx_bwd, pad], axis=0)   # bwd: right pad

        outf, outb, hN, cN = bilstm_layer(gx_fwd, gx_bwd, whf_t, whb_t,
                                          Tb=Tb, vmem_limit=vmem_limit)
        if P:
            outf = outf[P:]
            outb = outb[:T]
        h_list.append(hN)
        c_list.append(cN)
        inputs = [outf, outb]        # next layer projects the halves separately

    # output[:, :, :H] + output[:, :, H:]  ==  last-layer fwd + bwd
    # (plain XLA add, fused under jit — no extra kernel launch / HBM round trip)
    output = outf + outb
    # TODO(synk): nn.Dropout(0.1) training-mode stochastic mask not implemented;
    #             eval-mode identity used.
    h_n = jnp.concatenate(h_list, axis=0)        # (num_layers*2, B, H)
    c_n = jnp.concatenate(c_list, axis=0)        # (num_layers*2, B, H)
    return output, (h_n, c_n)


# ----------------------------------------------------------------------------
# Pure-JAX reference (per-step, f32), for correctness checking only.
# ----------------------------------------------------------------------------
def _lstm_dir_ref(x, w_ih, w_hh, b_ih, b_hh, reverse):
    T, B, _ = x.shape
    H = w_hh.shape[1]
    h = jnp.zeros((B, H), jnp.float32)
    c = jnp.zeros((B, H), jnp.float32)
    outs = [None] * T
    ts = range(T - 1, -1, -1) if reverse else range(T)
    for t in ts:
        g = x[t] @ w_ih.T + b_ih + h @ w_hh.T + b_hh
        i_g = jax.nn.sigmoid(g[:, :H])
        f_g = jax.nn.sigmoid(g[:, H:2 * H])
        g_g = jnp.tanh(g[:, 2 * H:3 * H])
        o_g = jax.nn.sigmoid(g[:, 3 * H:])
        c = f_g * c + i_g * g_g
        h = o_g * jnp.tanh(c)
        outs[t] = h
    return jnp.stack(outs, 0), h, c


def encoder_forward_ref(params, x):
    layer_in = x
    h_list, c_list = [], []
    for layer_params in params:
        outs = []
        for d, (w_ih, w_hh, b_ih, b_hh) in enumerate(layer_params):
            o, h, c = _lstm_dir_ref(layer_in, w_ih, w_hh, b_ih, b_hh, d == 1)
            outs.append(o)
            h_list.append(h)
            c_list.append(c)
        layer_in = jnp.concatenate(outs, -1)
    H = params[0][0][1].shape[1]
    out = layer_in[:, :, :H] + layer_in[:, :, H:]
    return out, (jnp.stack(h_list, 0), jnp.stack(c_list, 0))


if __name__ == "__main__":
    n_feats, hidden_size, num_layers = 8, 32, 2
    T, B = 8, 2

    key = jax.random.PRNGKey(0)
    key, xkey = jax.random.split(key)
    x = jax.random.normal(xkey, (T, B, n_feats), dtype=jnp.float32)

    params = init_encoder_params(key, n_feats, hidden_size, num_layers)

    output, (h_n, c_n) = encoder_forward(params, x)
    jax.block_until_ready((output, h_n, c_n))

    assert output.shape == (T, B, hidden_size)
    assert h_n.shape == (num_layers * 2, B, hidden_size)
    assert c_n.shape == (num_layers * 2, B, hidden_size)
    assert output.dtype == jnp.float32

    # Correctness vs. pure-f32 reference (tolerance relaxed for the bf16
    # recurrence matmul; c/gate accumulation stays f32 inside the kernel).
    out_ref, (h_ref, c_ref) = encoder_forward_ref(params, x)
    np.testing.assert_allclose(np.asarray(output), np.asarray(out_ref),
                               rtol=2e-2, atol=2e-2)
    np.testing.assert_allclose(np.asarray(h_n), np.asarray(h_ref),
                               rtol=2e-2, atol=2e-2)
    np.testing.assert_allclose(np.asarray(c_n), np.asarray(c_ref),
                               rtol=2e-2, atol=2e-2)

    print("KERNEL_OK")
</pallas_src>

<mosaic_0001>
module attributes {stable_mosaic.version = 11 : i64} {
  func.func @_bilstm_layer_kernel(%arg0: i32, %arg1: memref<8x2x128xf32, #tpu.memory_space<vmem>>, %arg2: memref<8x2x128xf32, #tpu.memory_space<vmem>>, %arg3: memref<32x128xbf16, #tpu.memory_space<vmem>>, %arg4: memref<32x128xbf16, #tpu.memory_space<vmem>>, %arg5: memref<8x2x32xf32, #tpu.memory_space<vmem>>, %arg6: memref<8x2x32xf32, #tpu.memory_space<vmem>>, %arg7: memref<2x2x32xf32, #tpu.memory_space<vmem>>, %arg8: memref<2x2x32xf32, #tpu.memory_space<vmem>>) attributes {dimension_semantics = [#tpu.dimension_semantics<arbitrary>], iteration_bounds = array<i64: 1>, scalar_prefetch = 0 : i64, scratch_operands = 0 : i64, tpu.core_type = #tpu.core_type<tc>, window_params = [{transform_indices = @transform_0, window_bounds = array<i64: 8, 2, 128>}, {transform_indices = @transform_1, window_bounds = array<i64: 8, 2, 128>}, {pipeline_mode = #tpu.pipeline_mode<synchronous>, transform_indices = @transform_2, window_bounds = array<i64: 32, 128>}, {pipeline_mode = #tpu.pipeline_mode<synchronous>, transform_indices = @transform_3, window_bounds = array<i64: 32, 128>}, {transform_indices = @transform_4, window_bounds = array<i64: 8, 2, 32>}, {transform_indices = @transform_5, window_bounds = array<i64: 8, 2, 32>}, {pipeline_mode = #tpu.pipeline_mode<synchronous>, transform_indices = @transform_6, window_bounds = array<i64: 2, 2, 32>}, {pipeline_mode = #tpu.pipeline_mode<synchronous>, transform_indices = @transform_7, window_bounds = array<i64: 2, 2, 32>}]} {
    %c0_i32 = arith.constant 0 : i32
    %0 = arith.cmpi eq, %arg0, %c0_i32 : i32
    %1 = arith.extui %0 : i1 to i32
    %c0_i32_0 = arith.constant 0 : i32
    %2 = arith.cmpi ne, %1, %c0_i32_0 : i32
    scf.if %2 {
      %cst_139 = arith.constant 0.000000e+00 : f32
      %457 = vector.broadcast %cst_139 : f32 to vector<2x2x32xf32>
      %c0_140 = arith.constant 0 : index
      %c0_141 = arith.constant 0 : index
      %c0_142 = arith.constant 0 : index
      %458 = vector.load %arg7[%c0_140, %c0_141, %c0_142] : memref<2x2x32xf32, #tpu.memory_space<vmem>>, vector<2x2x32xf32>
      tpu.vector_store %arg7[%c0_140, %c0_141, %c0_142], %457 {strides = array<i32>} : memref<2x2x32xf32, #tpu.memory_space<vmem>>, vector<2x2x32xf32>,
      %cst_143 = arith.constant 0.000000e+00 : f32
      %459 = vector.broadcast %cst_143 : f32 to vector<2x2x32xf32>
      %c0_144 = arith.constant 0 : index
      %c0_145 = arith.constant 0 : index
      %c0_146 = arith.constant 0 : index
      %460 = vector.load %arg8[%c0_144, %c0_145, %c0_146] : memref<2x2x32xf32, #tpu.memory_space<vmem>>, vector<2x2x32xf32>
      tpu.vector_store %arg8[%c0_144, %c0_145, %c0_146], %459 {strides = array<i32>} : memref<2x2x32xf32, #tpu.memory_space<vmem>>, vector<2x2x32xf32>,
    } else {
    }
    %c0 = arith.constant 0 : index
    %c0_1 = arith.constant 0 : index
    %3 = vector.load %arg3[%c0, %c0_1] : memref<32x128xbf16, #tpu.memory_space<vmem>>, vector<32x128xbf16>
    %c0_2 = arith.constant 0 : index
    %c0_3 = arith.constant 0 : index
    %4 = vector.load %arg4[%c0_2, %c0_3] : memref<32x128xbf16, #tpu.memory_space<vmem>>, vector<32x128xbf16>
    %c0_4 = arith.constant 0 : index
    %c0_5 = arith.constant 0 : index
    %c0_6 = arith.constant 0 : index
    %5 = vector.load %arg7[%c0_4, %c0_5, %c0_6] : memref<2x2x32xf32, #tpu.memory_space<vmem>>, vector<1x2x32xf32>
    %6 = vector.shape_cast %5 : vector<1x2x32xf32> to vector<2x32xf32>
    %c0_7 = arith.constant 0 : index
    %c0_8 = arith.constant 0 : index
    %c0_9 = arith.constant 0 : index
    %7 = vector.load %arg8[%c0_7, %c0_8, %c0_9] : memref<2x2x32xf32, #tpu.memory_space<vmem>>, vector<1x2x32xf32>
    %8 = vector.shape_cast %7 : vector<1x2x32xf32> to vector<2x32xf32>
    %c1 = arith.constant 1 : index
    %c0_10 = arith.constant 0 : index
    %c0_11 = arith.constant 0 : index
    %9 = vector.load %arg7[%c1, %c0_10, %c0_11] : memref<2x2x32xf32, #tpu.memory_space<vmem>>, vector<1x2x32xf32>
    %10 = vector.shape_cast %9 : vector<1x2x32xf32> to vector<2x32xf32>
    %c1_12 = arith.constant 1 : index
    %c0_13 = arith.constant 0 : index
    %c0_14 = arith.constant 0 : index
    %11 = vector.load %arg8[%c1_12, %c0_13, %c0_14] : memref<2x2x32xf32, #tpu.memory_space<vmem>>, vector<1x2x32xf32>
    %12 = vector.shape_cast %11 : vector<1x2x32xf32> to vector<2x32xf32>
    %c0_i32_15 = arith.constant 0 : i32
    %13 = arith.index_cast %c0_i32_15 : i32 to index
    %c0_16 = arith.constant 0 : index
    %c0_17 = arith.constant 0 : index
    %14 = vector.load %arg1[%13, %c0_16, %c0_17] : memref<8x2x128xf32, #tpu.memory_space<vmem>>, vector<1x2x128xf32>
    %15 = vector.shape_cast %14 : vector<1x2x128xf32> to vector<2x128xf32>
    %16 = arith.truncf %6 : vector<2x32xf32> to vector<2x32xbf16>
    %cst = arith.constant dense<0.000000e+00> : vector<2x128xf32>
    %17 = tpu.matmul %16, %3, %cst {dimension_numbers = #tpu.dot_dimension_numbers<[1], [0], [0], [1], [0, 0, 1, 1], [], []>} : vector<2x32xbf16>, vector<32x128xbf16>, vector<2x128xf32> -> vector<2x128xf32>
    %18 = arith.addf %15, %17 : vector<2x128xf32>
    %c7_i32 = arith.constant 7 : i32
    %19 = arith.subi %c7_i32, %c0_i32_15 : i32
    %20 = arith.index_cast %19 : i32 to index
    %c0_18 = arith.constant 0 : index
    %c0_19 = arith.constant 0 : index
    %21 = vector.load %arg2[%20, %c0_18, %c0_19] : memref<8x2x128xf32, #tpu.memory_space<vmem>>, vector<1x2x128xf32>
    %22 = vector.shape_cast %21 : vector<1x2x128xf32> to vector<2x128xf32>
    %23 = arith.truncf %10 : vector<2x32xf32> to vector<2x32xbf16>
    %cst_20 = arith.constant dense<0.000000e+00> : vector<2x128xf32>
    %24 = tpu.matmul %23, %4, %cst_20 {dimension_numbers = #tpu.dot_dimension_numbers<[1], [0], [0], [1], [0, 0, 1, 1], [], []>} : vector<2x32xbf16>, vector<32x128xbf16>, vector<2x128xf32> -> vector<2x128xf32>
    %25 = arith.addf %22, %24 : vector<2x128xf32>
    %26 = vector.extract_strided_slice %18 {offsets = [0, 0], sizes = [2, 96], strides = [1, 1]} : vector<2x128xf32> to vector<2x96xf32>
    %27 = arith.negf %26 : vector<2x96xf32>
    %28 = math.exp %27 : vector<2x96xf32>
    %cst_21 = arith.constant 1.000000e+00 : f32
    %29 = vector.broadcast %cst_21 : f32 to vector<2x96xf32>
    %30 = arith.addf %29, %28 : vector<2x96xf32>
    %31 = arith.divf %29, %30 : vector<2x96xf32>
    %32 = vector.extract_strided_slice %18 {offsets = [0, 96], sizes = [2, 32], strides = [1, 1]} : vector<2x128xf32> to vector<2x32xf32>
    %33 = math.tanh %32 : vector<2x32xf32>
    %34 = vector.extract_strided_slice %31 {offsets = [0, 0], sizes = [2, 32], strides = [1, 1]} : vector<2x96xf32> to vector<2x32xf32>
    %35 = vector.extract_strided_slice %31 {offsets = [0, 32], sizes = [2, 32], strides = [1, 1]} : vector<2x96xf32> to vector<2x32xf32>
    %36 = vector.extract_strided_slice %31 {offsets = [0, 64], sizes = [2, 32], strides = [1, 1]} : vector<2x96xf32> to vector<2x32xf32>
    %37 = arith.mulf %35, %8 : vector<2x32xf32>
    %38 = arith.mulf %34, %33 : vector<2x32xf32>
    %39 = arith.addf %37, %38 : vector<2x32xf32>
    %40 = math.tanh %39 : vector<2x32xf32>
    %41 = arith.mulf %36, %40 : vector<2x32xf32>
    %42 = vector.extract_strided_slice %25 {offsets = [0, 0], sizes = [2, 96], strides = [1, 1]} : vector<2x128xf32> to vector<2x96xf32>
    %43 = arith.negf %42 : vector<2x96xf32>
    %44 = math.exp %43 : vector<2x96xf32>
    %cst_22 = arith.constant 1.000000e+00 : f32
    %45 = vector.broadcast %cst_22 : f32 to vector<2x96xf32>
    %46 = arith.addf %45, %44 : vector<2x96xf32>
    %47 = arith.divf %45, %46 : vector<2x96xf32>
    %48 = vector.extract_strided_slice %25 {offsets = [0, 96], sizes = [2, 32], strides = [1, 1]} : vector<2x128xf32> to vector<2x32xf32>
    %49 = math.tanh %48 : vector<2x32xf32>
    %50 = vector.extract_strided_slice %47 {offsets = [0, 0], sizes = [2, 32], strides = [1, 1]} : vector<2x96xf32> to vector<2x32xf32>
    %51 = vector.extract_strided_slice %47 {offsets = [0, 32], sizes = [2, 32], strides = [1, 1]} : vector<2x96xf32> to vector<2x32xf32>
    %52 = vector.extract_strided_slice %47 {offsets = [0, 64], sizes = [2, 32], strides = [1, 1]} : vector<2x96xf32> to vector<2x32xf32>
    %53 = arith.mulf %51, %12 : vector<2x32xf32>
    %54 = arith.mulf %50, %49 : vector<2x32xf32>
    %55 = arith.addf %53, %54 : vector<2x32xf32>
    %56 = math.tanh %55 : vector<2x32xf32>
    %57 = arith.mulf %52, %56 : vector<2x32xf32>
    %58 = arith.index_cast %c0_i32_15 : i32 to index
    %c0_23 = arith.constant 0 : index
    %c0_24 = arith.constant 0 : index
    %59 = vector.load %arg5[%58, %c0_23, %c0_24] : memref<8x2x32xf32, #tpu.memory_space<vmem>>, vector<1x2x32xf32>
    %60 = vector.shape_cast %59 : vector<1x2x32xf32> to vector<2x32xf32>
    %61 = vector.shape_cast %41 : vector<2x32xf32> to vector<1x2x32xf32>
    tpu.vector_store %arg5[%58, %c0_23, %c0_24], %61 {strides = array<i32>} : memref<8x2x32xf32, #tpu.memory_space<vmem>>, vector<1x2x32xf32>,
    %c7_i32_25 = arith.constant 7 : i32
    %62 = arith.subi %c7_i32_25, %c0_i32_15 : i32
    %63 = arith.index_cast %62 : i32 to index
    %c0_26 = arith.constant 0 : index
    %c0_27 = arith.constant 0 : index
    %64 = vector.load %arg6[%63, %c0_26, %c0_27] : memref<8x2x32xf32, #tpu.memory_space<vmem>>, vector<1x2x32xf32>
    %65 = vector.shape_cast %64 : vector<1x2x32xf32> to vector<2x32xf32>
    %66 = vector.shape_cast %57 : vector<2x32xf32> to vector<1x2x32xf32>
    tpu.vector_store %arg6[%63, %c0_26, %c0_27], %66 {strides = array<i32>} : memref<8x2x32xf32, #tpu.memory_space<vmem>>, vector<1x2x32xf32>,
    %c1_i32 = arith.constant 1 : i32
    %67 = arith.index_cast %c1_i32 : i32 to index
    %c0_28 = arith.constant 0 : index
    %c0_29 = arith.constant 0 : index
    %68 = vector.load %arg1[%67, %c0_28, %c0_29] : memref<8x2x128xf32, #tpu.memory_space<vmem>>, vector<1x2x128xf32>
    %69 = vector.shape_cast %68 : vector<1x2x128xf32> to vector<2x128xf32>
    %70 = arith.truncf %41 : vector<2x32xf32> to vector<2x32xbf16>
    %cst_30 = arith.constant dense<0.000000e+00> : vector<2x128xf32>
    %71 = tpu.matmul %70, %3, %cst_30 {dimension_numbers = #tpu.dot_dimension_numbers<[1], [0], [0], [1], [0, 0, 1, 1], [], []>} : vector<2x32xbf16>, vector<32x128xbf16>, vector<2x128xf32> -> vector<2x128xf32>
    %72 = arith.addf %69, %71 : vector<2x128xf32>
    %c7_i32_31 = arith.constant 7 : i32
    %73 = arith.subi %c7_i32_31, %c1_i32 : i32
    %74 = arith.index_cast %73 : i32 to index
    %c0_32 = arith.constant 0 : index
    %c0_33 = arith.constant 0 : index
    %75 = vector.load %arg2[%74, %c0_32, %c0_33] : memref<8x2x128xf32, #tpu.memory_space<vmem>>, vector<1x2x128xf32>
    %76 = vector.shape_cast %75 : vector<1x2x128xf32> to vector<2x128xf32>
    %77 = arith.truncf %57 : vector<2x32xf32> to vector<2x32xbf16>
    %cst_34 = arith.constant dense<0.000000e+00> : vector<2x128xf32>
    %78 = tpu.matmul %77, %4, %cst_34 {dimension_numbers = #tpu.dot_dimension_numbers<[1], [0], [0], [1], [0, 0, 1, 1], [], []>} : vector<2x32xbf16>, vector<32x128xbf16>, vector<2x128xf32> -> vector<2x128xf32>
    %79 = arith.addf %76, %78 : vector<2x128xf32>
    %80 = vector.extract_strided_slice %72 {offsets = [0, 0], sizes = [2, 96], strides = [1, 1]} : vector<2x128xf32> to vector<2x96xf32>
    %81 = arith.negf %80 : vector<2x96xf32>
    %82 = math.exp %81 : vector<2x96xf32>
    %cst_35 = arith.constant 1.000000e+00 : f32
    %83 = vector.broadcast %cst_35 : f32 to vector<2x96xf32>
    %84 = arith.addf %83, %82 : vector<2x96xf32>
    %85 = arith.divf %83, %84 : vector<2x96xf32>
    %86 = vector.extract_strided_slice %72 {offsets = [0, 96], sizes = [2, 32], strides = [1, 1]} : vector<2x128xf32> to vector<2x32xf32>
    %87 = math.tanh %86 : vector<2x32xf32>
    %88 = vector.extract_strided_slice %85 {offsets = [0, 0], sizes = [2, 32], strides = [1, 1]} : vector<2x96xf32> to vector<2x32xf32>
    %89 = vector.extract_strided_slice %85 {offsets = [0, 32], sizes = [2, 32], strides = [1, 1]} : vector<2x96xf32> to vector<2x32xf32>
    %90 = vector.extract_strided_slice %85 {offsets = [0, 64], sizes = [2, 32], strides = [1, 1]} : vector<2x96xf32> to vector<2x32xf32>
    %91 = arith.mulf %89, %39 : vector<2x32xf32>
    %92 = arith.mulf %88, %87 : vector<2x32xf32>
    %93 = arith.addf %91, %92 : vector<2x32xf32>
    %94 = math.tanh %93 : vector<2x32xf32>
    %95 = arith.mulf %90, %94 : vector<2x32xf32>
    %96 = vector.extract_strided_slice %79 {offsets = [0, 0], sizes = [2, 96], strides = [1, 1]} : vector<2x128xf32> to vector<2x96xf32>
    %97 = arith.negf %96 : vector<2x96xf32>
    %98 = math.exp %97 : vector<2x96xf32>
    %cst_36 = arith.constant 1.000000e+00 : f32
    %99 = vector.broadcast %cst_36 : f32 to vector<2x96xf32>
    %100 = arith.addf %99, %98 : vector<2x96xf32>
    %101 = arith.divf %99, %100 : vector<2x96xf32>
    %102 = vector.extract_strided_slice %79 {offsets = [0, 96], sizes = [2, 32], strides = [1, 1]} : vector<2x128xf32> to vector<2x32xf32>
    %103 = math.tanh %102 : vector<2x32xf32>
    %104 = vector.extract_strided_slice %101 {offsets = [0, 0], sizes = [2, 32], strides = [1, 1]} : vector<2x96xf32> to vector<2x32xf32>
    %105 = vector.extract_strided_slice %101 {offsets = [0, 32], sizes = [2, 32], strides = [1, 1]} : vector<2x96xf32> to vector<2x32xf32>
    %106 = vector.extract_strided_slice %101 {offsets = [0, 64], sizes = [2, 32], strides = [1, 1]} : vector<2x96xf32> to vector<2x32xf32>
    %107 = arith.mulf %105, %55 : vector<2x32xf32>
    %108 = arith.mulf %104, %103 : vector<2x32xf32>
    %109 = arith.addf %107, %108 : vector<2x32xf32>
    %110 = math.tanh %109 : vector<2x32xf32>
    %111 = arith.mulf %106, %110 : vector<2x32xf32>
    %112 = arith.index_cast %c1_i32 : i32 to index
    %c0_37 = arith.constant 0 : index
    %c0_38 = arith.constant 0 : index
    %113 = vector.load %arg5[%112, %c0_37, %c0_38] : memref<8x2x32xf32, #tpu.memory_space<vmem>>, vector<1x2x32xf32>
    %114 = vector.shape_cast %113 : vector<1x2x32xf32> to vector<2x32xf32>
    %115 = vector.shape_cast %95 : vector<2x32xf32> to vector<1x2x32xf32>
    tpu.vector_store %arg5[%112, %c0_37, %c0_38], %115 {strides = array<i32>} : memref<8x2x32xf32, #tpu.memory_space<vmem>>, vector<1x2x32xf32>,
    %c7_i32_39 = arith.constant 7 : i32
    %116 = arith.subi %c7_i32_39, %c1_i32 : i32
    %117 = arith.index_cast %116 : i32 to index
    %c0_40 = arith.constant 0 : index
    %c0_41 = arith.constant 0 : index
    %118 = vector.load %arg6[%117, %c0_40, %c0_41] : memref<8x2x32xf32, #tpu.memory_space<vmem>>, vector<1x2x32xf32>
    %119 = vector.shape_cast %118 : vector<1x2x32xf32> to vector<2x32xf32>
    %120 = vector.shape_cast %111 : vector<2x32xf32> to vector<1x2x32xf32>
    tpu.vector_store %arg6[%117, %c0_40, %c0_41], %120 {strides = array<i32>} : memref<8x2x32xf32, #tpu.memory_space<vmem>>, vector<1x2x32xf32>,
    %c2_i32 = arith.constant 2 : i32
    %121 = arith.index_cast %c2_i32 : i32 to index
    %c0_42 = arith.constant 0 : index
    %c0_43 = arith.constant 0 : index
    %122 = vector.load %arg1[%121, %c0_42, %c0_43] : memref<8x2x128xf32, #tpu.memory_space<vmem>>, vector<1x2x128xf32>
    %123 = vector.shape_cast %122 : vector<1x2x128xf32> to vector<2x128xf32>
    %124 = arith.truncf %95 : vector<2x32xf32> to vector<2x32xbf16>
    %cst_44 = arith.constant dense<0.000000e+00> : vector<2x128xf32>
    %125 = tpu.matmul %124, %3, %cst_44 {dimension_numbers = #tpu.dot_dimension_numbers<[1], [0], [0], [1], [0, 0, 1, 1], [], []>} : vector<2x32xbf16>, vector<32x128xbf16>, vector<2x128xf32> -> vector<2x128xf32>
    %126 = arith.addf %123, %125 : vector<2x128xf32>
    %c7_i32_45 = arith.constant 7 : i32
    %127 = arith.subi %c7_i32_45, %c2_i32 : i32
    %128 = arith.index_cast %127 : i32 to index
    %c0_46 = arith.constant 0 : index
    %c0_47 = arith.constant 0 : index
    %129 = vector.load %arg2[%128, %c0_46, %c0_47] : memref<8x2x128xf32, #tpu.memory_space<vmem>>, vector<1x2x128xf32>
    %130 = vector.shape_cast %129 : vector<1x2x128xf32> to vector<2x128xf32>
    %131 = arith.truncf %111 : vector<2x32xf32> to vector<2x32xbf16>
    %cst_48 = arith.constant dense<0.000000e+00> : vector<2x128xf32>
    %132 = tpu.matmul %131, %4, %cst_48 {dimension_numbers = #tpu.dot_dimension_numbers<[1], [0], [0], [1], [0, 0, 1, 1], [], []>} : vector<2x32xbf16>, vector<32x128xbf16>, vector<2x128xf32> -> vector<2x128xf32>
    %133 = arith.addf %130, %132 : vector<2x128xf32>
    %134 = vector.extract_strided_slice %126 {offsets = [0, 0], sizes = [2, 96], strides = [1, 1]} : vector<2x128xf32> to vector<2x96xf32>
    %135 = arith.negf %134 : vector<2x96xf32>
    %136 = math.exp %135 : vector<2x96xf32>
    %cst_49 = arith.constant 1.000000e+00 : f32
    %137 = vector.broadcast %cst_49 : f32 to vector<2x96xf32>
    %138 = arith.addf %137, %136 : vector<2x96xf32>
    %139 = arith.divf %137, %138 : vector<2x96xf32>
    %140 = vector.extract_strided_slice %126 {offsets = [0, 96], sizes = [2, 32], strides = [1, 1]} : vector<2x128xf32> to vector<2x32xf32>
    %141 = math.tanh %140 : vector<2x32xf32>
    %142 = vector.extract_strided_slice %139 {offsets = [0, 0], sizes = [2, 32], strides = [1, 1]} : vector<2x96xf32> to vector<2x32xf32>
    %143 = vector.extract_strided_slice %139 {offsets = [0, 32], sizes = [2, 32], strides = [1, 1]} : vector<2x96xf32> to vector<2x32xf32>
    %144 = vector.extract_strided_slice %139 {offsets = [0, 64], sizes = [2, 32], strides = [1, 1]} : vector<2x96xf32> to vector<2x32xf32>
    %145 = arith.mulf %143, %93 : vector<2x32xf32>
    %146 = arith.mulf %142, %141 : vector<2x32xf32>
    %147 = arith.addf %145, %146 : vector<2x32xf32>
    %148 = math.tanh %147 : vector<2x32xf32>
    %149 = arith.mulf %144, %148 : vector<2x32xf32>
    %150 = vector.extract_strided_slice %133 {offsets = [0, 0], sizes = [2, 96], strides = [1, 1]} : vector<2x128xf32> to vector<2x96xf32>
    %151 = arith.negf %150 : vector<2x96xf32>
    %152 = math.exp %151 : vector<2x96xf32>
    %cst_50 = arith.constant 1.000000e+00 : f32
    %153 = vector.broadcast %cst_50 : f32 to vector<2x96xf32>
    %154 = arith.addf %153, %152 : vector<2x96xf32>
    %155 = arith.divf %153, %154 : vector<2x96xf32>
    %156 = vector.extract_strided_slice %133 {offsets = [0, 96], sizes = [2, 32], strides = [1, 1]} : vector<2x128xf32> to vector<2x32xf32>
    %157 = math.tanh %156 : vector<2x32xf32>
    %158 = vector.extract_strided_slice %155 {offsets = [0, 0], sizes = [2, 32], strides = [1, 1]} : vector<2x96xf32> to vector<2x32xf32>
    %159 = vector.extract_strided_slice %155 {offsets = [0, 32], sizes = [2, 32], strides = [1, 1]} : vector<2x96xf32> to vector<2x32xf32>
    %160 = vector.extract_strided_slice %155 {offsets = [0, 64], sizes = [2, 32], strides = [1, 1]} : vector<2x96xf32> to vector<2x32xf32>
    %161 = arith.mulf %159, %109 : vector<2x32xf32>
    %162 = arith.mulf %158, %157 : vector<2x32xf32>
    %163 = arith.addf %161, %162 : vector<2x32xf32>
    %164 = math.tanh %163 : vector<2x32xf32>
    %165 = arith.mulf %160, %164 : vector<2x32xf32>
    %166 = arith.index_cast %c2_i32 : i32 to index
    %c0_51 = arith.constant 0 : index
    %c0_52 = arith.constant 0 : index
    %167 = vector.load %arg5[%166, %c0_51, %c0_52] : memref<8x2x32xf32, #tpu.memory_space<vmem>>, vector<1x2x32xf32>
    %168 = vector.shape_cast %167 : vector<1x2x32xf32> to vector<2x32xf32>
    %169 = vector.shape_cast %149 : vector<2x32xf32> to vector<1x2x32xf32>
    tpu.vector_store %arg5[%166, %c0_51, %c0_52], %169 {strides = array<i32>} : memref<8x2x32xf32, #tpu.memory_space<vmem>>, vector<1x2x32xf32>,
    %c7_i32_53 = arith.constant 7 : i32
    %170 = arith.subi %c7_i32_53, %c2_i32 : i32
    %171 = arith.index_cast %170 : i32 to index
    %c0_54 = arith.constant 0 : index
    %c0_55 = arith.constant 0 : index
    %172 = vector.load %arg6[%171, %c0_54, %c0_55] : memref<8x2x32xf32, #tpu.memory_space<vmem>>, vector<1x2x32xf32>
    %173 = vector.shape_cast %172 : vector<1x2x32xf32> to vector<2x32xf32>
    %174 = vector.shape_cast %165 : vector<2x32xf32> to vector<1x2x32xf32>
    tpu.vector_store %arg6[%171, %c0_54, %c0_55], %174 {strides = array<i32>} : memref<8x2x32xf32, #tpu.memory_space<vmem>>, vector<1x2x32xf32>,
    %c3_i32 = arith.constant 3 : i32
    %175 = arith.index_cast %c3_i32 : i32 to index
    %c0_56 = arith.constant 0 : index
    %c0_57 = arith.constant 0 : index
    %176 = vector.load %arg1[%175, %c0_56, %c0_57] : memref<8x2x128xf32, #tpu.memory_space<vmem>>, vector<1x2x128xf32>
    %177 = vector.shape_cast %176 : vector<1x2x128xf32> to vector<2x128xf32>
    %178 = arith.truncf %149 : vector<2x32xf32> to vector<2x32xbf16>
    %cst_58 = arith.constant dense<0.000000e+00> : vector<2x128xf32>
    %179 = tpu.matmul %178, %3, %cst_58 {dimension_numbers = #tpu.dot_dimension_numbers<[1], [0], [0], [1], [0, 0, 1, 1], [], []>} : vector<2x32xbf16>, vector<32x128xbf16>, vector<2x128xf32> -> vector<2x128xf32>
    %180 = arith.addf %177, %179 : vector<2x128xf32>
    %c7_i32_59 = arith.constant 7 : i32
    %181 = arith.subi %c7_i32_59, %c3_i32 : i32
    %182 = arith.index_cast %181 : i32 to index
    %c0_60 = arith.constant 0 : index
    %c0_61 = arith.constant 0 : index
    %183 = vector.load %arg2[%182, %c0_60, %c0_61] : memref<8x2x128xf32, #tpu.memory_space<vmem>>, vector<1x2x128xf32>
    %184 = vector.shape_cast %183 : vector<1x2x128xf32> to vector<2x128xf32>
    %185 = arith.truncf %165 : vector<2x32xf32> to vector<2x32xbf16>
    %cst_62 = arith.constant dense<0.000000e+00> : vector<2x128xf32>
    %186 = tpu.matmul %185, %4, %cst_62 {dimension_numbers = #tpu.dot_dimension_numbers<[1], [0], [0], [1], [0, 0, 1, 1], [], []>} : vector<2x32xbf16>, vector<32x128xbf16>, vector<2x128xf32> -> vector<2x128xf32>
    %187 = arith.addf %184, %186 : vector<2x128xf32>
    %188 = vector.extract_strided_slice %180 {offsets = [0, 0], sizes = [2, 96], strides = [1, 1]} : vector<2x128xf32> to vector<2x96xf32>
    %189 = arith.negf %188 : vector<2x96xf32>
    %190 = math.exp %189 : vector<2x96xf32>
    %cst_63 = arith.constant 1.000000e+00 : f32
    %191 = vector.broadcast %cst_63 : f32 to vector<2x96xf32>
    %192 = arith.addf %191, %190 : vector<2x96xf32>
    %193 = arith.divf %191, %192 : vector<2x96xf32>
    %194 = vector.extract_strided_slice %180 {offsets = [0, 96], sizes = [2, 32], strides = [1, 1]} : vector<2x128xf32> to vector<2x32xf32>
    %195 = math.tanh %194 : vector<2x32xf32>
    %196 = vector.extract_strided_slice %193 {offsets = [0, 0], sizes = [2, 32], strides = [1, 1]} : vector<2x96xf32> to vector<2x32xf32>
    %197 = vector.extract_strided_slice %193 {offsets = [0, 32], sizes = [2, 32], strides = [1, 1]} : vector<2x96xf32> to vector<2x32xf32>
    %198 = vector.extract_strided_slice %193 {offsets = [0, 64], sizes = [2, 32], strides = [1, 1]} : vector<2x96xf32> to vector<2x32xf32>
    %199 = arith.mulf %197, %147 : vector<2x32xf32>
    %200 = arith.mulf %196, %195 : vector<2x32xf32>
    %201 = arith.addf %199, %200 : vector<2x32xf32>
    %202 = math.tanh %201 : vector<2x32xf32>
    %203 = arith.mulf %198, %202 : vector<2x32xf32>
    %204 = vector.extract_strided_slice %187 {offsets = [0, 0], sizes = [2, 96], strides = [1, 1]} : vector<2x128xf32> to vector<2x96xf32>
    %205 = arith.negf %204 : vector<2x96xf32>
    %206 = math.exp %205 : vector<2x96xf32>
    %cst_64 = arith.constant 1.000000e+00 : f32
    %207 = vector.broadcast %cst_64 : f32 to vector<2x96xf32>
    %208 = arith.addf %207, %206 : vector<2x96xf32>
    %209 = arith.divf %207, %208 : vector<2x96xf32>
    %210 = vector.extract_strided_slice %187 {offsets = [0, 96], sizes = [2, 32], strides = [1, 1]} : vector<2x128xf32> to vector<2x32xf32>
    %211 = math.tanh %210 : vector<2x32xf32>
    %212 = vector.extract_strided_slice %209 {offsets = [0, 0], sizes = [2, 32], strides = [1, 1]} : vector<2x96xf32> to vector<2x32xf32>
    %213 = vector.extract_strided_slice %209 {offsets = [0, 32], sizes = [2, 32], strides = [1, 1]} : vector<2x96xf32> to vector<2x32xf32>
    %214 = vector.extract_strided_slice %209 {offsets = [0, 64], sizes = [2, 32], strides = [1, 1]} : vector<2x96xf32> to vector<2x32xf32>
    %215 = arith.mulf %213, %163 : vector<2x32xf32>
    %216 = arith.mulf %212, %211 : vector<2x32xf32>
    %217 = arith.addf %215, %216 : vector<2x32xf32>
    %218 = math.tanh %217 : vector<2x32xf32>
    %219 = arith.mulf %214, %218 : vector<2x32xf32>
    %220 = arith.index_cast %c3_i32 : i32 to index
    %c0_65 = arith.constant 0 : index
    %c0_66 = arith.constant 0 : index
    %221 = vector.load %arg5[%220, %c0_65, %c0_66] : memref<8x2x32xf32, #tpu.memory_space<vmem>>, vector<1x2x32xf32>
    %222 = vector.shape_cast %221 : vector<1x2x32xf32> to vector<2x32xf32>
    %223 = vector.shape_cast %203 : vector<2x32xf32> to vector<1x2x32xf32>
    tpu.vector_store %arg5[%220, %c0_65, %c0_66], %223 {strides = array<i32>} : memref<8x2x32xf32, #tpu.memory_space<vmem>>, vector<1x2x32xf32>,
    %c7_i32_67 = arith.constant 7 : i32
    %224 = arith.subi %c7_i32_67, %c3_i32 : i32
    %225 = arith.index_cast %224 : i32 to index
    %c0_68 = arith.constant 0 : index
    %c0_69 = arith.constant 0 : index
    %226 = vector.load %arg6[%225, %c0_68, %c0_69] : memref<8x2x32xf32, #tpu.memory_space<vmem>>, vector<1x2x32xf32>
    %227 = vector.shape_cast %226 : vector<1x2x32xf32> to vector<2x32xf32>
    %228 = vector.shape_cast %219 : vector<2x32xf32> to vector<1x2x32xf32>
    tpu.vector_store %arg6[%225, %c0_68, %c0_69], %228 {strides = array<i32>} : memref<8x2x32xf32, #tpu.memory_space<vmem>>, vector<1x2x32xf32>,
    %c4_i32 = arith.constant 4 : i32
    %229 = arith.index_cast %c4_i32 : i32 to index
    %c0_70 = arith.constant 0 : index
    %c0_71 = arith.constant 0 : index
    %230 = vector.load %arg1[%229, %c0_70, %c0_71] : memref<8x2x128xf32, #tpu.memory_space<vmem>>, vector<1x2x128xf32>
    %231 = vector.shape_cast %230 : vector<1x2x128xf32> to vector<2x128xf32>
    %232 = arith.truncf %203 : vector<2x32xf32> to vector<2x32xbf16>
    %cst_72 = arith.constant dense<0.000000e+00> : vector<2x128xf32>
    %233 = tpu.matmul %232, %3, %cst_72 {dimension_numbers = #tpu.dot_dimension_numbers<[1], [0], [0], [1], [0, 0, 1, 1], [], []>} : vector<2x32xbf16>, vector<32x128xbf16>, vector<2x128xf32> -> vector<2x128xf32>
    %234 = arith.addf %231, %233 : vector<2x128xf32>
    %c7_i32_73 = arith.constant 7 : i32
    %235 = arith.subi %c7_i32_73, %c4_i32 : i32
    %236 = arith.index_cast %235 : i32 to index
    %c0_74 = arith.constant 0 : index
    %c0_75 = arith.constant 0 : index
    %237 = vector.load %arg2[%236, %c0_74, %c0_75] : memref<8x2x128xf32, #tpu.memory_space<vmem>>, vector<1x2x128xf32>
    %238 = vector.shape_cast %237 : vector<1x2x128xf32> to vector<2x128xf32>
    %239 = arith.truncf %219 : vector<2x32xf32> to vector<2x32xbf16>
    %cst_76 = arith.constant dense<0.000000e+00> : vector<2x128xf32>
    %240 = tpu.matmul %239, %4, %cst_76 {dimension_numbers = #tpu.dot_dimension_numbers<[1], [0], [0], [1], [0, 0, 1, 1], [], []>} : vector<2x32xbf16>, vector<32x128xbf16>, vector<2x128xf32> -> vector<2x128xf32>
    %241 = arith.addf %238, %240 : vector<2x128xf32>
    %242 = vector.extract_strided_slice %234 {offsets = [0, 0], sizes = [2, 96], strides = [1, 1]} : vector<2x128xf32> to vector<2x96xf32>
    %243 = arith.negf %242 : vector<2x96xf32>
    %244 = math.exp %243 : vector<2x96xf32>
    %cst_77 = arith.constant 1.000000e+00 : f32
    %245 = vector.broadcast %cst_77 : f32 to vector<2x96xf32>
    %246 = arith.addf %245, %244 : vector<2x96xf32>
    %247 = arith.divf %245, %246 : vector<2x96xf32>
    %248 = vector.extract_strided_slice %234 {offsets = [0, 96], sizes = [2, 32], strides = [1, 1]} : vector<2x128xf32> to vector<2x32xf32>
    %249 = math.tanh %248 : vector<2x32xf32>
    %250 = vector.extract_strided_slice %247 {offsets = [0, 0], sizes = [2, 32], strides = [1, 1]} : vector<2x96xf32> to vector<2x32xf32>
    %251 = vector.extract_strided_slice %247 {offsets = [0, 32], sizes = [2, 32], strides = [1, 1]} : vector<2x96xf32> to vector<2x32xf32>
    %252 = vector.extract_strided_slice %247 {offsets = [0, 64], sizes = [2, 32], strides = [1, 1]} : vector<2x96xf32> to vector<2x32xf32>
    %253 = arith.mulf %251, %201 : vector<2x32xf32>
    %254 = arith.mulf %250, %249 : vector<2x32xf32>
    %255 = arith.addf %253, %254 : vector<2x32xf32>
    %256 = math.tanh %255 : vector<2x32xf32>
    %257 = arith.mulf %252, %256 : vector<2x32xf32>
    %258 = vector.extract_strided_slice %241 {offsets = [0, 0], sizes = [2, 96], strides = [1, 1]} : vector<2x128xf32> to vector<2x96xf32>
    %259 = arith.negf %258 : vector<2x96xf32>
    %260 = math.exp %259 : vector<2x96xf32>
    %cst_78 = arith.constant 1.000000e+00 : f32
    %261 = vector.broadcast %cst_78 : f32 to vector<2x96xf32>
    %262 = arith.addf %261, %260 : vector<2x96xf32>
    %263 = arith.divf %261, %262 : vector<2x96xf32>
    %264 = vector.extract_strided_slice %241 {offsets = [0, 96], sizes = [2, 32], strides = [1, 1]} : vector<2x128xf32> to vector<2x32xf32>
    %265 = math.tanh %264 : vector<2x32xf32>
    %266 = vector.extract_strided_slice %263 {offsets = [0, 0], sizes = [2, 32], strides = [1, 1]} : vector<2x96xf32> to vector<2x32xf32>
    %267 = vector.extract_strided_slice %263 {offsets = [0, 32], sizes = [2, 32], strides = [1, 1]} : vector<2x96xf32> to vector<2x32xf32>
    %268 = vector.extract_strided_slice %263 {offsets = [0, 64], sizes = [2, 32], strides = [1, 1]} : vector<2x96xf32> to vector<2x32xf32>
    %269 = arith.mulf %267, %217 : vector<2x32xf32>
    %270 = arith.mulf %266, %265 : vector<2x32xf32>
    %271 = arith.addf %269, %270 : vector<2x32xf32>
    %272 = math.tanh %271 : vector<2x32xf32>
    %273 = arith.mulf %268, %272 : vector<2x32xf32>
    %274 = arith.index_cast %c4_i32 : i32 to index
    %c0_79 = arith.constant 0 : index
    %c0_80 = arith.constant 0 : index
    %275 = vector.load %arg5[%274, %c0_79, %c0_80] : memref<8x2x32xf32, #tpu.memory_space<vmem>>, vector<1x2x32xf32>
    %276 = vector.shape_cast %275 : vector<1x2x32xf32> to vector<2x32xf32>
    %277 = vector.shape_cast %257 : vector<2x32xf32> to vector<1x2x32xf32>
    tpu.vector_store %arg5[%274, %c0_79, %c0_80], %277 {strides = array<i32>} : memref<8x2x32xf32, #tpu.memory_space<vmem>>, vector<1x2x32xf32>,
    %c7_i32_81 = arith.constant 7 : i32
    %278 = arith.subi %c7_i32_81, %c4_i32 : i32
    %279 = arith.index_cast %278 : i32 to index
    %c0_82 = arith.constant 0 : index
    %c0_83 = arith.constant 0 : index
    %280 = vector.load %arg6[%279, %c0_82, %c0_83] : memref<8x2x32xf32, #tpu.memory_space<vmem>>, vector<1x2x32xf32>
    %281 = vector.shape_cast %280 : vector<1x2x32xf32> to vector<2x32xf32>
    %282 = vector.shape_cast %273 : vector<2x32xf32> to vector<1x2x32xf32>
    tpu.vector_store %arg6[%279, %c0_82, %c0_83], %282 {strides = array<i32>} : memref<8x2x32xf32, #tpu.memory_space<vmem>>, vector<1x2x32xf32>,
    %c5_i32 = arith.constant 5 : i32
    %283 = arith.index_cast %c5_i32 : i32 to index
    %c0_84 = arith.constant 0 : index
    %c0_85 = arith.constant 0 : index
    %284 = vector.load %arg1[%283, %c0_84, %c0_85] : memref<8x2x128xf32, #tpu.memory_space<vmem>>, vector<1x2x128xf32>
    %285 = vector.shape_cast %284 : vector<1x2x128xf32> to vector<2x128xf32>
    %286 = arith.truncf %257 : vector<2x32xf32> to vector<2x32xbf16>
    %cst_86 = arith.constant dense<0.000000e+00> : vector<2x128xf32>
    %287 = tpu.matmul %286, %3, %cst_86 {dimension_numbers = #tpu.dot_dimension_numbers<[1], [0], [0], [1], [0, 0, 1, 1], [], []>} : vector<2x32xbf16>, vector<32x128xbf16>, vector<2x128xf32> -> vector<2x128xf32>
    %288 = arith.addf %285, %287 : vector<2x128xf32>
    %c7_i32_87 = arith.constant 7 : i32
    %289 = arith.subi %c7_i32_87, %c5_i32 : i32
    %290 = arith.index_cast %289 : i32 to index
    %c0_88 = arith.constant 0 : index
    %c0_89 = arith.constant 0 : index
    %291 = vector.load %arg2[%290, %c0_88, %c0_89] : memref<8x2x128xf32, #tpu.memory_space<vmem>>, vector<1x2x128xf32>
    %292 = vector.shape_cast %291 : vector<1x2x128xf32> to vector<2x128xf32>
    %293 = arith.truncf %273 : vector<2x32xf32> to vector<2x32xbf16>
    %cst_90 = arith.constant dense<0.000000e+00> : vector<2x128xf32>
    %294 = tpu.matmul %293, %4, %cst_90 {dimension_numbers = #tpu.dot_dimension_numbers<[1], [0], [0], [1], [0, 0, 1, 1], [], []>} : vector<2x32xbf16>, vector<32x128xbf16>, vector<2x128xf32> -> vector<2x128xf32>
    %295 = arith.addf %292, %294 : vector<2x128xf32>
    %296 = vector.extract_strided_slice %288 {offsets = [0, 0], sizes = [2, 96], strides = [1, 1]} : vector<2x128xf32> to vector<2x96xf32>
    %297 = arith.negf %296 : vector<2x96xf32>
    %298 = math.exp %297 : vector<2x96xf32>
    %cst_91 = arith.constant 1.000000e+00 : f32
    %299 = vector.broadcast %cst_91 : f32 to vector<2x96xf32>
    %300 = arith.addf %299, %298 : vector<2x96xf32>
    %301 = arith.divf %299, %300 : vector<2x96xf32>
    %302 = vector.extract_strided_slice %288 {offsets = [0, 96], sizes = [2, 32], strides = [1, 1]} : vector<2x128xf32> to vector<2x32xf32>
    %303 = math.tanh %302 : vector<2x32xf32>
    %304 = vector.extract_strided_slice %301 {offsets = [0, 0], sizes = [2, 32], strides = [1, 1]} : vector<2x96xf32> to vector<2x32xf32>
    %305 = vector.extract_strided_slice %301 {offsets = [0, 32], sizes = [2, 32], strides = [1, 1]} : vector<2x96xf32> to vector<2x32xf32>
    %306 = vector.extract_strided_slice %301 {offsets = [0, 64], sizes = [2, 32], strides = [1, 1]} : vector<2x96xf32> to vector<2x32xf32>
    %307 = arith.mulf %305, %255 : vector<2x32xf32>
    %308 = arith.mulf %304, %303 : vector<2x32xf32>
    %309 = arith.addf %307, %308 : vector<2x32xf32>
    %310 = math.tanh %309 : vector<2x32xf32>
    %311 = arith.mulf %306, %310 : vector<2x32xf32>
    %312 = vector.extract_strided_slice %295 {offsets = [0, 0], sizes = [2, 96], strides = [1, 1]} : vector<2x128xf32> to vector<2x96xf32>
    %313 = arith.negf %312 : vector<2x96xf32>
    %314 = math.exp %313 : vector<2x96xf32>
    %cst_92 = arith.constant 1.000000e+00 : f32
    %315 = vector.broadcast %cst_92 : f32 to vector<2x96xf32>
    %316 = arith.addf %315, %314 : vector<2x96xf32>
    %317 = arith.divf %315, %316 : vector<2x96xf32>
    %318 = vector.extract_strided_slice %295 {offsets = [0, 96], sizes = [2, 32], strides = [1, 1]} : vector<2x128xf32> to vector<2x32xf32>
    %319 = math.tanh %318 : vector<2x32xf32>
    %320 = vector.extract_strided_slice %317 {offsets = [0, 0], sizes = [2, 32], strides = [1, 1]} : vector<2x96xf32> to vector<2x32xf32>
    %321 = vector.extract_strided_slice %317 {offsets = [0, 32], sizes = [2, 32], strides = [1, 1]} : vector<2x96xf32> to vector<2x32xf32>
    %322 = vector.extract_strided_slice %317 {offsets = [0, 64], sizes = [2, 32], strides = [1, 1]} : vector<2x96xf32> to vector<2x32xf32>
    %323 = arith.mulf %321, %271 : vector<2x32xf32>
    %324 = arith.mulf %320, %319 : vector<2x32xf32>
    %325 = arith.addf %323, %324 : vector<2x32xf32>
    %326 = math.tanh %325 : vector<2x32xf32>
    %327 = arith.mulf %322, %326 : vector<2x32xf32>
    %328 = arith.index_cast %c5_i32 : i32 to index
    %c0_93 = arith.constant 0 : index
    %c0_94 = arith.constant 0 : index
    %329 = vector.load %arg5[%328, %c0_93, %c0_94] : memref<8x2x32xf32, #tpu.memory_space<vmem>>, vector<1x2x32xf32>
    %330 = vector.shape_cast %329 : vector<1x2x32xf32> to vector<2x32xf32>
    %331 = vector.shape_cast %311 : vector<2x32xf32> to vector<1x2x32xf32>
    tpu.vector_store %arg5[%328, %c0_93, %c0_94], %331 {strides = array<i32>} : memref<8x2x32xf32, #tpu.memory_space<vmem>>, vector<1x2x32xf32>,
    %c7_i32_95 = arith.constant 7 : i32
    %332 = arith.subi %c7_i32_95, %c5_i32 : i32
    %333 = arith.index_cast %332 : i32 to index
    %c0_96 = arith.constant 0 : index
    %c0_97 = arith.constant 0 : index
    %334 = vector.load %arg6[%333, %c0_96, %c0_97] : memref<8x2x32xf32, #tpu.memory_space<vmem>>, vector<1x2x32xf32>
    %335 = vector.shape_cast %334 : vector<1x2x32xf32> to vector<2x32xf32>
    %336 = vector.shape_cast %327 : vector<2x32xf32> to vector<1x2x32xf32>
    tpu.vector_store %arg6[%333, %c0_96, %c0_97], %336 {strides = array<i32>} : memref<8x2x32xf32, #tpu.memory_space<vmem>>, vector<1x2x32xf32>,
    %c6_i32 = arith.constant 6 : i32
    %337 = arith.index_cast %c6_i32 : i32 to index
    %c0_98 = arith.constant 0 : index
    %c0_99 = arith.constant 0 : index
    %338 = vector.load %arg1[%337, %c0_98, %c0_99] : memref<8x2x128xf32, #tpu.memory_space<vmem>>, vector<1x2x128xf32>
    %339 = vector.shape_cast %338 : vector<1x2x128xf32> to vector<2x128xf32>
    %340 = arith.truncf %311 : vector<2x32xf32> to vector<2x32xbf16>
    %cst_100 = arith.constant dense<0.000000e+00> : vector<2x128xf32>
    %341 = tpu.matmul %340, %3, %cst_100 {dimension_numbers = #tpu.dot_dimension_numbers<[1], [0], [0], [1], [0, 0, 1, 1], [], []>} : vector<2x32xbf16>, vector<32x128xbf16>, vector<2x128xf32> -> vector<2x128xf32>
    %342 = arith.addf %339, %341 : vector<2x128xf32>
    %c7_i32_101 = arith.constant 7 : i32
    %343 = arith.subi %c7_i32_101, %c6_i32 : i32
    %344 = arith.index_cast %343 : i32 to index
    %c0_102 = arith.constant 0 : index
    %c0_103 = arith.constant 0 : index
    %345 = vector.load %arg2[%344, %c0_102, %c0_103] : memref<8x2x128xf32, #tpu.memory_space<vmem>>, vector<1x2x128xf32>
    %346 = vector.shape_cast %345 : vector<1x2x128xf32> to vector<2x128xf32>
    %347 = arith.truncf %327 : vector<2x32xf32> to vector<2x32xbf16>
    %cst_104 = arith.constant dense<0.000000e+00> : vector<2x128xf32>
    %348 = tpu.matmul %347, %4, %cst_104 {dimension_numbers = #tpu.dot_dimension_numbers<[1], [0], [0], [1], [0, 0, 1, 1], [], []>} : vector<2x32xbf16>, vector<32x128xbf16>, vector<2x128xf32> -> vector<2x128xf32>
    %349 = arith.addf %346, %348 : vector<2x128xf32>
    %350 = vector.extract_strided_slice %342 {offsets = [0, 0], sizes = [2, 96], strides = [1, 1]} : vector<2x128xf32> to vector<2x96xf32>
    %351 = arith.negf %350 : vector<2x96xf32>
    %352 = math.exp %351 : vector<2x96xf32>
    %cst_105 = arith.constant 1.000000e+00 : f32
    %353 = vector.broadcast %cst_105 : f32 to vector<2x96xf32>
    %354 = arith.addf %353, %352 : vector<2x96xf32>
    %355 = arith.divf %353, %354 : vector<2x96xf32>
    %356 = vector.extract_strided_slice %342 {offsets = [0, 96], sizes = [2, 32], strides = [1, 1]} : vector<2x128xf32> to vector<2x32xf32>
    %357 = math.tanh %356 : vector<2x32xf32>
    %358 = vector.extract_strided_slice %355 {offsets = [0, 0], sizes = [2, 32], strides = [1, 1]} : vector<2x96xf32> to vector<2x32xf32>
    %359 = vector.extract_strided_slice %355 {offsets = [0, 32], sizes = [2, 32], strides = [1, 1]} : vector<2x96xf32> to vector<2x32xf32>
    %360 = vector.extract_strided_slice %355 {offsets = [0, 64], sizes = [2, 32], strides = [1, 1]} : vector<2x96xf32> to vector<2x32xf32>
    %361 = arith.mulf %359, %309 : vector<2x32xf32>
    %362 = arith.mulf %358, %357 : vector<2x32xf32>
    %363 = arith.addf %361, %362 : vector<2x32xf32>
    %364 = math.tanh %363 : vector<2x32xf32>
    %365 = arith.mulf %360, %364 : vector<2x32xf32>
    %366 = vector.extract_strided_slice %349 {offsets = [0, 0], sizes = [2, 96], strides = [1, 1]} : vector<2x128xf32> to vector<2x96xf32>
    %367 = arith.negf %366 : vector<2x96xf32>
    %368 = math.exp %367 : vector<2x96xf32>
    %cst_106 = arith.constant 1.000000e+00 : f32
    %369 = vector.broadcast %cst_106 : f32 to vector<2x96xf32>
    %370 = arith.addf %369, %368 : vector<2x96xf32>
    %371 = arith.divf %369, %370 : vector<2x96xf32>
    %372 = vector.extract_strided_slice %349 {offsets = [0, 96], sizes = [2, 32], strides = [1, 1]} : vector<2x128xf32> to vector<2x32xf32>
    %373 = math.tanh %372 : vector<2x32xf32>
    %374 = vector.extract_strided_slice %371 {offsets = [0, 0], sizes = [2, 32], strides = [1, 1]} : vector<2x96xf32> to vector<2x32xf32>
    %375 = vector.extract_strided_slice %371 {offsets = [0, 32], sizes = [2, 32], strides = [1, 1]} : vector<2x96xf32> to vector<2x32xf32>
    %376 = vector.extract_strided_slice %371 {offsets = [0, 64], sizes = [2, 32], strides = [1, 1]} : vector<2x96xf32> to vector<2x32xf32>
    %377 = arith.mulf %375, %325 : vector<2x32xf32>
    %378 = arith.mulf %374, %373 : vector<2x32xf32>
    %379 = arith.addf %377, %378 : vector<2x32xf32>
    %380 = math.tanh %379 : vector<2x32xf32>
    %381 = arith.mulf %376, %380 : vector<2x32xf32>
    %382 = arith.index_cast %c6_i32 : i32 to index
    %c0_107 = arith.constant 0 : index
    %c0_108 = arith.constant 0 : index
    %383 = vector.load %arg5[%382, %c0_107, %c0_108] : memref<8x2x32xf32, #tpu.memory_space<vmem>>, vector<1x2x32xf32>
    %384 = vector.shape_cast %383 : vector<1x2x32xf32> to vector<2x32xf32>
    %385 = vector.shape_cast %365 : vector<2x32xf32> to vector<1x2x32xf32>
    tpu.vector_store %arg5[%382, %c0_107, %c0_108], %385 {strides = array<i32>} : memref<8x2x32xf32, #tpu.memory_space<vmem>>, vector<1x2x32xf32>,
    %c7_i32_109 = arith.constant 7 : i32
    %386 = arith.subi %c7_i32_109, %c6_i32 : i32
    %387 = arith.index_cast %386 : i32 to index
    %c0_110 = arith.constant 0 : index
    %c0_111 = arith.constant 0 : index
    %388 = vector.load %arg6[%387, %c0_110, %c0_111] : memref<8x2x32xf32, #tpu.memory_space<vmem>>, vector<1x2x32xf32>
    %389 = vector.shape_cast %388 : vector<1x2x32xf32> to vector<2x32xf32>
    %390 = vector.shape_cast %381 : vector<2x32xf32> to vector<1x2x32xf32>
    tpu.vector_store %arg6[%387, %c0_110, %c0_111], %390 {strides = array<i32>} : memref<8x2x32xf32, #tpu.memory_space<vmem>>, vector<1x2x32xf32>,
    %c7_i32_112 = arith.constant 7 : i32
    %391 = arith.index_cast %c7_i32_112 : i32 to index
    %c0_113 = arith.constant 0 : index
    %c0_114 = arith.constant 0 : index
    %392 = vector.load %arg1[%391, %c0_113, %c0_114] : memref<8x2x128xf32, #tpu.memory_space<vmem>>, vector<1x2x128xf32>
    %393 = vector.shape_cast %392 : vector<1x2x128xf32> to vector<2x128xf32>
    %394 = arith.truncf %365 : vector<2x32xf32> to vector<2x32xbf16>
    %cst_115 = arith.constant dense<0.000000e+00> : vector<2x128xf32>
    %395 = tpu.matmul %394, %3, %cst_115 {dimension_numbers = #tpu.dot_dimension_numbers<[1], [0], [0], [1], [0, 0, 1, 1], [], []>} : vector<2x32xbf16>, vector<32x128xbf16>, vector<2x128xf32> -> vector<2x128xf32>
    %396 = arith.addf %393, %395 : vector<2x128xf32>
    %c7_i32_116 = arith.constant 7 : i32
    %397 = arith.subi %c7_i32_116, %c7_i32_112 : i32
    %398 = arith.index_cast %397 : i32 to index
    %c0_117 = arith.constant 0 : index
    %c0_118 = arith.constant 0 : index
    %399 = vector.load %arg2[%398, %c0_117, %c0_118] : memref<8x2x128xf32, #tpu.memory_space<vmem>>, vector<1x2x128xf32>
    %400 = vector.shape_cast %399 : vector<1x2x128xf32> to vector<2x128xf32>
    %401 = arith.truncf %381 : vector<2x32xf32> to vector<2x32xbf16>
    %cst_119 = arith.constant dense<0.000000e+00> : vector<2x128xf32>
    %402 = tpu.matmul %401, %4, %cst_119 {dimension_numbers = #tpu.dot_dimension_numbers<[1], [0], [0], [1], [0, 0, 1, 1], [], []>} : vector<2x32xbf16>, vector<32x128xbf16>, vector<2x128xf32> -> vector<2x128xf32>
    %403 = arith.addf %400, %402 : vector<2x128xf32>
    %404 = vector.extract_strided_slice %396 {offsets = [0, 0], sizes = [2, 96], strides = [1, 1]} : vector<2x128xf32> to vector<2x96xf32>
    %405 = arith.negf %404 : vector<2x96xf32>
    %406 = math.exp %405 : vector<2x96xf32>
    %cst_120 = arith.constant 1.000000e+00 : f32
    %407 = vector.broadcast %cst_120 : f32 to vector<2x96xf32>
    %408 = arith.addf %407, %406 : vector<2x96xf32>
    %409 = arith.divf %407, %408 : vector<2x96xf32>
    %410 = vector.extract_strided_slice %396 {offsets = [0, 96], sizes = [2, 32], strides = [1, 1]} : vector<2x128xf32> to vector<2x32xf32>
    %411 = math.tanh %410 : vector<2x32xf32>
    %412 = vector.extract_strided_slice %409 {offsets = [0, 0], sizes = [2, 32], strides = [1, 1]} : vector<2x96xf32> to vector<2x32xf32>
    %413 = vector.extract_strided_slice %409 {offsets = [0, 32], sizes = [2, 32], strides = [1, 1]} : vector<2x96xf32> to vector<2x32xf32>
    %414 = vector.extract_strided_slice %409 {offsets = [0, 64], sizes = [2, 32], strides = [1, 1]} : vector<2x96xf32> to vector<2x32xf32>
    %415 = arith.mulf %413, %363 : vector<2x32xf32>
    %416 = arith.mulf %412, %411 : vector<2x32xf32>
    %417 = arith.addf %415, %416 : vector<2x32xf32>
    %418 = math.tanh %417 : vector<2x32xf32>
    %419 = arith.mulf %414, %418 : vector<2x32xf32>
    %420 = vector.extract_strided_slice %403 {offsets = [0, 0], sizes = [2, 96], strides = [1, 1]} : vector<2x128xf32> to vector<2x96xf32>
    %421 = arith.negf %420 : vector<2x96xf32>
    %422 = math.exp %421 : vector<2x96xf32>
    %cst_121 = arith.constant 1.000000e+00 : f32
    %423 = vector.broadcast %cst_121 : f32 to vector<2x96xf32>
    %424 = arith.addf %423, %422 : vector<2x96xf32>
    %425 = arith.divf %423, %424 : vector<2x96xf32>
    %426 = vector.extract_strided_slice %403 {offsets = [0, 96], sizes = [2, 32], strides = [1, 1]} : vector<2x128xf32> to vector<2x32xf32>
    %427 = math.tanh %426 : vector<2x32xf32>
    %428 = vector.extract_strided_slice %425 {offsets = [0, 0], sizes = [2, 32], strides = [1, 1]} : vector<2x96xf32> to vector<2x32xf32>
    %429 = vector.extract_strided_slice %425 {offsets = [0, 32], sizes = [2, 32], strides = [1, 1]} : vector<2x96xf32> to vector<2x32xf32>
    %430 = vector.extract_strided_slice %425 {offsets = [0, 64], sizes = [2, 32], strides = [1, 1]} : vector<2x96xf32> to vector<2x32xf32>
    %431 = arith.mulf %429, %379 : vector<2x32xf32>
    %432 = arith.mulf %428, %427 : vector<2x32xf32>
    %433 = arith.addf %431, %432 : vector<2x32xf32>
    %434 = math.tanh %433 : vector<2x32xf32>
    %435 = arith.mulf %430, %434 : vector<2x32xf32>
    %436 = arith.index_cast %c7_i32_112 : i32 to index
    %c0_122 = arith.constant 0 : index
    %c0_123 = arith.constant 0 : index
    %437 = vector.load %arg5[%436, %c0_122, %c0_123] : memref<8x2x32xf32, #tpu.memory_space<vmem>>, vector<1x2x32xf32>
    %438 = vector.shape_cast %437 : vector<1x2x32xf32> to vector<2x32xf32>
    %439 = vector.shape_cast %419 : vector<2x32xf32> to vector<1x2x32xf32>
    tpu.vector_store %arg5[%436, %c0_122, %c0_123], %439 {strides = array<i32>} : memref<8x2x32xf32, #tpu.memory_space<vmem>>, vector<1x2x32xf32>,
    %c7_i32_124 = arith.constant 7 : i32
    %440 = arith.subi %c7_i32_124, %c7_i32_112 : i32
    %441 = arith.index_cast %440 : i32 to index
    %c0_125 = arith.constant 0 : index
    %c0_126 = arith.constant 0 : index
    %442 = vector.load %arg6[%441, %c0_125, %c0_126] : memref<8x2x32xf32, #tpu.memory_space<vmem>>, vector<1x2x32xf32>
    %443 = vector.shape_cast %442 : vector<1x2x32xf32> to vector<2x32xf32>
    %444 = vector.shape_cast %435 : vector<2x32xf32> to vector<1x2x32xf32>
    tpu.vector_store %arg6[%441, %c0_125, %c0_126], %444 {strides = array<i32>} : memref<8x2x32xf32, #tpu.memory_space<vmem>>, vector<1x2x32xf32>,
    %c8_i32 = arith.constant 8 : i32
    %c0_127 = arith.constant 0 : index
    %c0_128 = arith.constant 0 : index
    %c0_129 = arith.constant 0 : index
    %445 = vector.load %arg7[%c0_127, %c0_128, %c0_129] : memref<2x2x32xf32, #tpu.memory_space<vmem>>, vector<1x2x32xf32>
    %446 = vector.shape_cast %445 : vector<1x2x32xf32> to vector<2x32xf32>
    %447 = vector.shape_cast %419 : vector<2x32xf32> to vector<1x2x32xf32>
    tpu.vector_store %arg7[%c0_127, %c0_128, %c0_129], %447 {strides = array<i32>} : memref<2x2x32xf32, #tpu.memory_space<vmem>>, vector<1x2x32xf32>,
    %c0_130 = arith.constant 0 : index
    %c0_131 = arith.constant 0 : index
    %c0_132 = arith.constant 0 : index
    %448 = vector.load %arg8[%c0_130, %c0_131, %c0_132] : memref<2x2x32xf32, #tpu.memory_space<vmem>>, vector<1x2x32xf32>
    %449 = vector.shape_cast %448 : vector<1x2x32xf32> to vector<2x32xf32>
    %450 = vector.shape_cast %417 : vector<2x32xf32> to vector<1x2x32xf32>
    tpu.vector_store %arg8[%c0_130, %c0_131, %c0_132], %450 {strides = array<i32>} : memref<2x2x32xf32, #tpu.memory_space<vmem>>, vector<1x2x32xf32>,
    %c1_133 = arith.constant 1 : index
    %c0_134 = arith.constant 0 : index
    %c0_135 = arith.constant 0 : index
    %451 = vector.load %arg7[%c1_133, %c0_134, %c0_135] : memref<2x2x32xf32, #tpu.memory_space<vmem>>, vector<1x2x32xf32>
    %452 = vector.shape_cast %451 : vector<1x2x32xf32> to vector<2x32xf32>
    %453 = vector.shape_cast %435 : vector<2x32xf32> to vector<1x2x32xf32>
    tpu.vector_store %arg7[%c1_133, %c0_134, %c0_135], %453 {strides = array<i32>} : memref<2x2x32xf32, #tpu.memory_space<vmem>>, vector<1x2x32xf32>,
    %c1_136 = arith.constant 1 : index
    %c0_137 = arith.constant 0 : index
    %c0_138 = arith.constant 0 : index
    %454 = vector.load %arg8[%c1_136, %c0_137, %c0_138] : memref<2x2x32xf32, #tpu.memory_space<vmem>>, vector<1x2x32xf32>
    %455 = vector.shape_cast %454 : vector<1x2x32xf32> to vector<2x32xf32>
    %456 = vector.shape_cast %433 : vector<2x32xf32> to vector<1x2x32xf32>
    tpu.vector_store %arg8[%c1_136, %c0_137, %c0_138], %456 {strides = array<i32>} : memref<2x2x32xf32, #tpu.memory_space<vmem>>, vector<1x2x32xf32>,
    return
  }
  func.func @transform_0(%arg0: i32) -> (i32, i32, i32) {
    %c0_i32 = arith.constant 0 : i32
    %c0_i32_0 = arith.constant 0 : i32
    %c0_i32_1 = arith.constant 0 : i32
    return %arg0, %c0_i32, %c0_i32_0 : i32, i32, i32
  }
  func.func @transform_1(%arg0: i32) -> (i32, i32, i32) {
    %c0_i32 = arith.constant 0 : i32
    %0 = arith.subi %c0_i32, %arg0 : i32
    %c0_i32_0 = arith.constant 0 : i32
    %c0_i32_1 = arith.constant 0 : i32
    %c0_i32_2 = arith.constant 0 : i32
    return %0, %c0_i32_0, %c0_i32_1 : i32, i32, i32
  }
  func.func @transform_2(%arg0: i32) -> (i32, i32) {
    %c0_i32 = arith.constant 0 : i32
    %c0_i32_0 = arith.constant 0 : i32
    %c0_i32_1 = arith.constant 0 : i32
    return %c0_i32, %c0_i32_0 : i32, i32
  }
  func.func @transform_3(%arg0: i32) -> (i32, i32) {
    %c0_i32 = arith.constant 0 : i32
    %c0_i32_0 = arith.constant 0 : i32
    %c0_i32_1 = arith.constant 0 : i32
    return %c0_i32, %c0_i32_0 : i32, i32
  }
  func.func @transform_4(%arg0: i32) -> (i32, i32, i32) {
    %c0_i32 = arith.constant 0 : i32
    %c0_i32_0 = arith.constant 0 : i32
    %c0_i32_1 = arith.constant 0 : i32
    return %arg0, %c0_i32, %c0_i32_0 : i32, i32, i32
  }
  func.func @transform_5(%arg0: i32) -> (i32, i32, i32) {
    %c0_i32 = arith.constant 0 : i32
    %0 = arith.subi %c0_i32, %arg0 : i32
    %c0_i32_0 = arith.constant 0 : i32
    %c0_i32_1 = arith.constant 0 : i32
    %c0_i32_2 = arith.constant 0 : i32
    return %0, %c0_i32_0, %c0_i32_1 : i32, i32, i32
  }
  func.func @transform_6(%arg0: i32) -> (i32, i32, i32) {
    %c0_i32 = arith.constant 0 : i32
    %c0_i32_0 = arith.constant 0 : i32
    %c0_i32_1 = arith.constant 0 : i32
    %c0_i32_2 = arith.constant 0 : i32
    return %c0_i32, %c0_i32_0, %c0_i32_1 : i32, i32, i32
  }
  func.func @transform_7(%arg0: i32) -> (i32, i32, i32) {
    %c0_i32 = arith.constant 0 : i32
    %c0_i32_0 = arith.constant 0 : i32
    %c0_i32_1 = arith.constant 0 : i32
    %c0_i32_2 = arith.constant 0 : i32
    return %c0_i32, %c0_i32_0, %c0_i32_1 : i32, i32, i32
  }
}

</mosaic_0001>

<bundles_post_ra>
// kernel: encoder_forward.2
= control target key start
LH: loop header
LB: loop body
LE: loop exit
PB: predicated region body
PF: predicated region fallthrough
CT: control target
= control target key end

     0   :  { %vm62_vm0 = vcmask 254976   ;;  %v1822_v0 = vmov 0.0   ;;  %vm1823_vm1 = vmmov 0   ;;  %vm95_vm2 = vcmask 261120   ;;  %s1825_s28 = smov 64   ;;  %s2357_s2 = inlined_call_operand.vmem [shape: bf16[32,128], index: 2, kind: input, shape index: {}]   ;;  %s2358_s3 = inlined_call_operand.vmem [shape: bf16[32,128], index: 3, kind: input, shape index: {}]   ;;  %s2359_s6 = inlined_call_operand.vmem [shape: f32[2,2,32], index: 6, kind: output, shape index: {2}]   ;;  %s2360_s7 = inlined_call_operand.vmem [shape: f32[2,2,32], index: 7, kind: output, shape index: {3}]   ;;  %s2361_s0 = inlined_call_operand.vmem [shape: f32[8,2,128], index: 0, kind: input, shape index: {}]   ;;  %s2362_s1 = inlined_call_operand.vmem [shape: f32[8,2,128], index: 1, kind: input, shape index: {}]   ;;  %s2363_s4 = inlined_call_operand.vmem [shape: f32[8,2,32], index: 4, kind: output, shape index: {0}]   ;;  %s2364_s5 = inlined_call_operand.vmem [shape: f32[8,2,32], index: 5, kind: output, shape index: {1}]  }
   0x1   :  { %1557 = vmatprep.subr.bf16.mxu0 %v1822_v0  ;;  %v1871_v1 = vld [vmem:[%s2357_s2] sm:$0xff]   ;;  %1565 = vmatprep.subr.bf16.mxu1 %v1822_v0  ;;  %63 = vst.msk [vmem:[%s2359_s6] sm:$0x3] %vm62_vm0, %v1822_v0  ;;  %64 = vst.msk [vmem:[%s2359_s6 + $0x2] sm:$0x3] %vm62_vm0, %v1822_v0  ;;  %v1907_v3 = vld [vmem:[%s2357_s2 + $0x8] sm:$0xff]  }
   0x2   :  { %65 = vst.msk [vmem:[%s2360_s7] sm:$0x3] %vm62_vm0, %v1822_v0  ;;  %66 = vst.msk [vmem:[%s2360_s7 + $0x2] sm:$0x3] %vm62_vm0, %v1822_v0  ;;  %v1897_v2 = vld [vmem:[%s2358_s3] sm:$0xff]   ;;  %1561 = vmatprep.mubr.msk.bf16.mxu0 %vm1823_vm1, %v1822_v0  ;;  %1569 = vmatprep.mubr.msk.bf16.mxu1 %vm1823_vm1, %v1822_v0  ;;  %v1914_v4 = vld [vmem:[%s2358_s3 + $0x8] sm:$0xff]  }
   0x3   :  { %1558 = vmatpush3.bf16.msra.mxu0 %v1871_v1  ;;  %1566 = vmatpush3.bf16.msra.mxu1 %v1897_v2  ;;  %s1824_s3 = smov 32   ;;  %v81_v11 = vld [vmem:[%s2361_s0] sm:$0x3]  ;;  %v1446_v12 = vld [vmem:[%s2362_s1 + $0xe] sm:$0x3] }
   0x4   :  { %1559 = vmatprep.subr.bf16.mxu0 %v1822_v0  ;;  %1567 = vmatprep.subr.bf16.mxu1 %v1822_v0  ;;  %v1453_v55 = vld [vmem:[%s2361_s0 + $0x2] sm:$0x3]  ;;  %v1455_v60 = vld [vmem:[%s2362_s1 + $0xc] sm:$0x3] }
   0x7   :  { %1560 = vmatpush3.bf16.msra.mxu0 %v1907_v3  ;;  %1568 = vmatpush3.bf16.msra.mxu1 %v1914_v4 }
   0x8   :  { %v75_v5 = vld [vmem:[%s2359_s6] sm:$0x3]  ;;  %v1441_v6 = vld [vmem:[%s2359_s6 + $0x2] sm:$0x3]  ;;  %1573 = vmatprep.subr.bf16.mxu0 %v1822_v0  ;;  %1581 = vmatprep.subr.bf16.mxu1 %v1822_v0 }
   0x9   :  { %v76_v7 = vld [vmem:[%s2360_s7] sm:$0x3]  ;;  %v82_v8 = vpack.c.bf16 %v75_v5, %v75_v5  ;;  %v142_v9 = vpack.c.bf16 %v1441_v6, %v1441_v6  ;;  %v1442_v10 = vld [vmem:[%s2360_s7 + $0x2] sm:$0x3] }
   0xa   :  { %207 = vrot.lane.b32.xlu1 %v76_v7, %s1824_s3 }
   0xb   :  { %1562 = vmatmul.mubr.msk.bf16.vlgmr.msra.gmra.mrb[0].mxu0 %vm95_vm2, %v82_v8  ;;  %1570 = vmatmul.mubr.msk.bf16.vlgmr.msra.gmra.mrb[0].mxu1 %vm95_vm2, %v142_v9 }
   0xc   :  { %1574 = vmatpush3.bf16.msra.mxu0 %v1871_v1  ;;  %1582 = vmatpush3.bf16.msra.mxu1 %v1897_v2 }
   0xd   :  { %1575 = vmatprep.subr.bf16.mxu0 %v1822_v0  ;;  %1577 = vmatprep.mubr.msk.bf16.mxu0 %vm1823_vm1, %v1822_v0 }
   0xe   :  { %235 = vrot.lane.b32.xlu1 %v1442_v10, %s1824_s3  ;;  %1583 = vmatprep.subr.bf16.mxu1 %v1822_v0 }
   0xf   :  { %1585 = vmatprep.mubr.msk.bf16.mxu1 %vm1823_vm1, %v1822_v0 }
  0x10   :  { %1576 = vmatpush3.bf16.msra.mxu0 %v1907_v3  ;;  %1584 = vmatpush3.bf16.msra.mxu1 %v1914_v4 }
  0x11   :  { %1589 = vmatprep.subr.bf16.mxu0 %v1822_v0  ;;  %1597 = vmatprep.subr.bf16.mxu1 %v1822_v0 }
  0x7c   :  { %v208_v37 = vpop.permute.xlu1 %207 }
  0x80   :  { %v236_v39 = vpop.permute.xlu1 %235 }
  0xde   :  { %v133_v13 = vpop.f32.mrb[0].mxu0  ;;  %v192_v14 = vpop.f32.mrb[0].mxu1 }
  0xdf   :  { %v139_v15 = vadd.f32 %v133_v13, %v81_v11  ;;  %v1563_v16 = vpop.f32.mrb[1].mxu0  ;;  %v198_v17 = vadd.f32 %v1446_v12, %v192_v14  ;;  %v1571_v18 = vpop.f32.mrb[1].mxu1 }
  0xe0   :  { %v136_v19 = vpop.f32.mrb[2].mxu0  ;;  %v195_v20 = vpop.f32.mrb[2].mxu1 }
  0xe1   :  { %1694 = vtanh.f32 %v139_v15  ;;  %v1564_v21 = vpop.f32.mrb[3].mxu0  ;;  %v1572_v22 = vpop.f32.mrb[3].mxu1  ;;  %v1450_v25 = vmul.f32 -1.442695, %v139_v15  ;;  %v1451_v26 = vmul.f32 -1.442695, %v198_v17 }
  0xe2   :  { %1696 = vtanh.f32 %v198_v17 }
  0xe3   :  { %1698 = vpow2.f32 %v1450_v25 }
  0xe4   :  { %1700 = vpow2.f32 %v1451_v26 }
  0xeb   :  { %v1695_v23 = vpop.eup %1694 }
  0xec   :  { %212 = vrot.lane.b32.xlu0 %v1695_v23, %s1824_s3  ;;  %v1697_v24 = vpop.eup %1696 }
  0xed   :  { %v1699_v27 = vpop.eup %1698 }
  0xee   :  { %v202_v28 = vadd.f32 1.0, %v1699_v27  ;;  %v1701_v29 = vpop.eup %1700 }
  0xef   :  { %v230_v30 = vadd.f32 1.0, %v1701_v29 }
  0xf0   :  { %240 = vrot.lane.b32.xlu0 %v1697_v24, %s1824_s3  ;;  %1702 = vrcp.f32 %v202_v28 }
  0xf1   :  { %1704 = vrcp.f32 %v230_v30 }
  0xfa   :  { %v1703_v31 = vpop.eup %1702 }
  0xfb   :  { %v1705_v34 = vpop.eup %1704  ;;  %v210_v38 = vmul.f32 %v1703_v31, %v208_v37 }
  0xfc   :  { %v238_v42 = vmul.f32 %v1705_v34, %v236_v39 }
 0x15e   :  { %v213_v32 = vpop.permute.xlu0 %212 }
 0x15f   :  { %v215_v33 = vmul.f32 %v1703_v31, %v213_v32 }
 0x161   :  { %217 = vrot.lane.b32.xlu0 %v215_v33, %s1824_s3 }
 0x162   :  { %v241_v35 = vpop.permute.xlu0 %240 }
 0x163   :  { %v243_v36 = vmul.f32 %v1705_v34, %v241_v35 }
 0x165   :  { %245 = vrot.lane.b32.xlu1 %v243_v36, %s1824_s3 }
 0x1d3   :  { %v218_v40 = vpop.permute.xlu0 %217 }
 0x1d4   :  { %v1959_v41 = vadd.f32 %v218_v40, %v210_v38  ;;  %v1461_v38 = vld [vmem:[%s2361_s0 + $0x4] sm:$0x3] }
 0x1d6   :  { %1706 = vtanh.f32 %v1959_v41 }
 0x1d7   :  { %v246_v43 = vpop.permute.xlu1 %245 }
 0x1d8   :  { %v1962_v44 = vadd.f32 %v246_v43, %v238_v42  ;;  %v1463_v43 = vld [vmem:[%s2362_s1 + $0xa] sm:$0x3] }
 0x1da   :  { %1708 = vtanh.f32 %v1962_v44 }
 0x1e0   :  { %v1707_v45 = vpop.eup %1706 }
 0x1e1   :  { %223 = vrot.lane.b32.xlu0 %v1707_v45, %s1824_s3 }
 0x1e4   :  { %v1709_v46 = vpop.eup %1708 }
 0x1e5   :  { %251 = vrot.lane.b32.xlu1 %v1709_v46, %s1824_s3 }
 0x253   :  { %v224_v47 = vpop.permute.xlu0 %223 }
 0x254   :  { %v1967_v48 = vmul.f32 %v1703_v31, %v224_v47 }
 0x256   :  { %v269_v49 = vpack.c.bf16 %v1967_v48, %v1967_v48 }
 0x257   :  { %v252_v50 = vpop.permute.xlu1 %251 }
 0x258   :  { %v1971_v51 = vmul.f32 %v1705_v34, %v252_v50  ;;  %271 = vrot.lane.b32.xlu0 %v269_v49, %s1825_s28 }
 0x25a   :  { %v319_v52 = vpack.c.bf16 %v1971_v51, %v1971_v51 }
 0x25c   :  { %321 = vrot.lane.b32.xlu1 %v319_v52, %s1825_s28 }
 0x2ca   :  { %v272_v53 = vpop.permute.xlu0 %271 }
 0x2cb   :  { %1578 = vmatmul.mubr.msk.bf16.vlgmr.msra.gmra.mrb[4].mxu0 %vm95_vm2, %v272_v53 }
 0x2cc   :  { %1590 = vmatpush3.bf16.msra.mxu0 %v1871_v1  ;;  %1593 = vmatprep.mubr.msk.bf16.mxu0 %vm1823_vm1, %v1822_v0 }
 0x2cd   :  { %1591 = vmatprep.subr.bf16.mxu0 %v1822_v0 }
 0x2ce   :  { %v322_v54 = vpop.permute.xlu1 %321 }
 0x2cf   :  { %1586 = vmatmul.mubr.msk.bf16.vlgmr.msra.gmra.mrb[4].mxu1 %vm95_vm2, %v322_v54 }
 0x2d0   :  { %1598 = vmatpush3.bf16.msra.mxu1 %v1897_v2  ;;  %1592 = vmatpush3.bf16.msra.mxu0 %v1907_v3 }
 0x2d1   :  { %1599 = vmatprep.subr.bf16.mxu1 %v1822_v0  ;;  %1601 = vmatprep.mubr.msk.bf16.mxu1 %vm1823_vm1, %v1822_v0 }
 0x2d2   :  { %1605 = vmatprep.subr.bf16.mxu0 %v1822_v0 }
 0x2d4   :  { %1600 = vmatpush3.bf16.msra.mxu1 %v1914_v4 }
 0x2d5   :  { %1613 = vmatprep.subr.bf16.mxu1 %v1822_v0 }
 0x39e   :  { %v310_v56 = vpop.f32.mrb[4].mxu0 }
 0x39f   :  { %v316_v57 = vadd.f32 %v1453_v55, %v310_v56  ;;  %v1579_v58 = vpop.f32.mrb[5].mxu0 }
 0x3a0   :  { %v313_v59 = vpop.f32.mrb[6].mxu0 }
 0x3a1   :  { %1710 = vtanh.f32 %v316_v57  ;;  %v1580_v61 = vpop.f32.mrb[7].mxu0  ;;  %v1457_v10 = vmul.f32 -1.442695, %v316_v57 }
 0x3a2   :  { %v360_v62 = vpop.f32.mrb[4].mxu1 }
 0x3a3   :  { %v366_v63 = vadd.f32 %v1455_v60, %v360_v62  ;;  %v1587_v5 = vpop.f32.mrb[5].mxu1 }
 0x3a4   :  { %v363_v6 = vpop.f32.mrb[6].mxu1 }
 0x3a5   :  { %1712 = vtanh.f32 %v366_v63  ;;  %v1588_v7 = vpop.f32.mrb[7].mxu1  ;;  %v1458_v11 = vmul.f32 -1.442695, %v366_v63 }
 0x3a6   :  { %1714 = vpow2.f32 %v1457_v10 }
 0x3a7   :  { %1716 = vpow2.f32 %v1458_v11 }
 0x3ab   :  { %v1711_v8 = vpop.eup %1710 }
 0x3ac   :  { %376 = vrot.lane.b32.xlu0 %v1711_v8, %s1824_s3 }
 0x3af   :  { %v1713_v9 = vpop.eup %1712 }
 0x3b0   :  { %400 = vrot.lane.b32.xlu1 %v1713_v9, %s1824_s3  ;;  %v1715_v12 = vpop.eup %1714 }
 0x3b1   :  { %v370_v13 = vadd.f32 1.0, %v1715_v12  ;;  %v1717_v14 = vpop.eup %1716 }
 0x3b2   :  { %v394_v15 = vadd.f32 1.0, %v1717_v14 }
 0x3b3   :  { %1718 = vrcp.f32 %v370_v13 }
 0x3b4   :  { %1720 = vrcp.f32 %v394_v15 }
 0x3bd   :  { %v1719_v16 = vpop.eup %1718 }
 0x3be   :  { %v1721_v19 = vpop.eup %1720  ;;  %v374_v22 = vmul.f32 %v1719_v16, %v1959_v41 }
 0x3bf   :  { %v398_v25 = vmul.f32 %v1721_v19, %v1962_v44 }
 0x41e   :  { %v377_v17 = vpop.permute.xlu0 %376 }
 0x41f   :  { %v379_v18 = vmul.f32 %v1719_v16, %v377_v17 }
 0x421   :  { %381 = vrot.lane.b32.xlu0 %v379_v18, %s1824_s3 }
 0x422   :  { %v401_v20 = vpop.permute.xlu1 %400 }
 0x423   :  { %v403_v21 = vmul.f32 %v1721_v19, %v401_v20 }
 0x425   :  { %405 = vrot.lane.b32.xlu1 %v403_v21, %s1824_s3 }
 0x493   :  { %v382_v23 = vpop.permute.xlu0 %381 }
 0x494   :  { %v2002_v24 = vadd.f32 %v382_v23, %v374_v22  ;;  %v1469_v23 = vld [vmem:[%s2361_s0 + $0x6] sm:$0x3] }
 0x496   :  { %1722 = vtanh.f32 %v2002_v24 }
 0x497   :  { %v406_v26 = vpop.permute.xlu1 %405 }
 0x498   :  { %v2006_v27 = vadd.f32 %v406_v26, %v398_v25 }
 0x49a   :  { %1724 = vtanh.f32 %v2006_v27 }
 0x4a0   :  { %v1723_v28 = vpop.eup %1722 }
 0x4a1   :  { %387 = vrot.lane.b32.xlu0 %v1723_v28, %s1824_s3  ;;  %v1471_v28 = vld [vmem:[%s2362_s1 + $0x8] sm:$0x3] }
 0x4a4   :  { %v1725_v29 = vpop.eup %1724 }
 0x4a5   :  { %411 = vrot.lane.b32.xlu1 %v1725_v29, %s1824_s3 }
 0x513   :  { %v388_v30 = vpop.permute.xlu0 %387 }
 0x514   :  { %v2011_v31 = vmul.f32 %v1719_v16, %v388_v30 }
 0x516   :  { %v429_v32 = vpack.c.bf16 %v2011_v31, %v2011_v31 }
 0x517   :  { %v412_v33 = vpop.permute.xlu1 %411 }
 0x518   :  { %v2015_v34 = vmul.f32 %v1721_v19, %v412_v33  ;;  %431 = vrot.lane.b32.xlu0 %v429_v32, %s1825_s28 }
 0x51a   :  { %v479_v35 = vpack.c.bf16 %v2015_v34, %v2015_v34 }
 0x51c   :  { %481 = vrot.lane.b32.xlu1 %v479_v35, %s1825_s28 }
 0x58a   :  { %v432_v36 = vpop.permute.xlu0 %431 }
 0x58b   :  { %1594 = vmatmul.mubr.msk.bf16.vlgmr.msra.gmra.mrb[8].mxu0 %vm95_vm2, %v432_v36 }
 0x58c   :  { %1606 = vmatpush3.bf16.msra.mxu0 %v1871_v1  ;;  %1609 = vmatprep.mubr.msk.bf16.mxu0 %vm1823_vm1, %v1822_v0 }
 0x58d   :  { %1607 = vmatprep.subr.bf16.mxu0 %v1822_v0 }
 0x58e   :  { %v482_v37 = vpop.permute.xlu1 %481 }
 0x58f   :  { %1602 = vmatmul.mubr.msk.bf16.vlgmr.msra.gmra.mrb[8].mxu1 %vm95_vm2, %v482_v37 }
 0x590   :  { %1614 = vmatpush3.bf16.msra.mxu1 %v1897_v2  ;;  %1608 = vmatpush3.bf16.msra.mxu0 %v1907_v3 }
 0x591   :  { %1615 = vmatprep.subr.bf16.mxu1 %v1822_v0  ;;  %1617 = vmatprep.mubr.msk.bf16.mxu1 %vm1823_vm1, %v1822_v0 }
 0x592   :  { %1621 = vmatprep.subr.bf16.mxu0 %v1822_v0 }
 0x594   :  { %1616 = vmatpush3.bf16.msra.mxu1 %v1914_v4 }
 0x595   :  { %1629 = vmatprep.subr.bf16.mxu1 %v1822_v0 }
 0x65e   :  { %v470_v39 = vpop.f32.mrb[8].mxu0 }
 0x65f   :  { %v476_v40 = vadd.f32 %v1461_v38, %v470_v39  ;;  %v1595_v41 = vpop.f32.mrb[9].mxu0 }
 0x660   :  { %v473_v42 = vpop.f32.mrb[10].mxu0 }
 0x661   :  { %1726 = vtanh.f32 %v476_v40  ;;  %v1596_v44 = vpop.f32.mrb[11].mxu0  ;;  %v1465_v54 = vmul.f32 -1.442695, %v476_v40 }
 0x662   :  { %v520_v45 = vpop.f32.mrb[8].mxu1 }
 0x663   :  { %v526_v46 = vadd.f32 %v1463_v43, %v520_v45  ;;  %v1603_v47 = vpop.f32.mrb[9].mxu1 }
 0x664   :  { %v523_v49 = vpop.f32.mrb[10].mxu1 }
 0x665   :  { %1728 = vtanh.f32 %v526_v46  ;;  %v1604_v50 = vpop.f32.mrb[11].mxu1  ;;  %v1466_v55 = vmul.f32 -1.442695, %v526_v46 }
 0x666   :  { %1730 = vpow2.f32 %v1465_v54 }
 0x667   :  { %1732 = vpow2.f32 %v1466_v55 }
 0x66b   :  { %v1727_v52 = vpop.eup %1726 }
 0x66c   :  { %536 = vrot.lane.b32.xlu0 %v1727_v52, %s1824_s3 }
 0x66f   :  { %v1729_v53 = vpop.eup %1728 }
 0x670   :  { %560 = vrot.lane.b32.xlu1 %v1729_v53, %s1824_s3  ;;  %v1731_v56 = vpop.eup %1730 }
 0x671   :  { %v530_v57 = vadd.f32 1.0, %v1731_v56  ;;  %v1733_v58 = vpop.eup %1732 }
 0x672   :  { %v554_v59 = vadd.f32 1.0, %v1733_v58 }
 0x673   :  { %1734 = vrcp.f32 %v530_v57 }
 0x674   :  { %1736 = vrcp.f32 %v554_v59 }
 0x67d   :  { %v1735_v60 = vpop.eup %1734 }
 0x67e   :  { %v1737_v63 = vpop.eup %1736  ;;  %v534_v7 = vmul.f32 %v1735_v60, %v2002_v24 }
 0x67f   :  { %v558_v10 = vmul.f32 %v1737_v63, %v2006_v27 }
 0x6de   :  { %v537_v61 = vpop.permute.xlu0 %536 }
 0x6df   :  { %v539_v62 = vmul.f32 %v1735_v60, %v537_v61 }
 0x6e1   :  { %541 = vrot.lane.b32.xlu0 %v539_v62, %s1824_s3 }
 0x6e2   :  { %v561_v5 = vpop.permute.xlu1 %560 }
 0x6e3   :  { %v563_v6 = vmul.f32 %v1737_v63, %v561_v5 }
 0x6e5   :  { %565 = vrot.lane.b32.xlu1 %v563_v6, %s1824_s3 }
 0x753   :  { %v542_v8 = vpop.permute.xlu0 %541 }
 0x754   :  { %v2046_v9 = vadd.f32 %v542_v8, %v534_v7 }
 0x756   :  { %1738 = vtanh.f32 %v2046_v9 }
 0x757   :  { %v566_v11 = vpop.permute.xlu1 %565 }
 0x758   :  { %v2050_v12 = vadd.f32 %v566_v11, %v558_v10  ;;  %v1477_v10 = vld [vmem:[%s2361_s0 + $0x8] sm:$0x3] }
 0x75a   :  { %1740 = vtanh.f32 %v2050_v12 }
 0x760   :  { %v1739_v13 = vpop.eup %1738 }
 0x761   :  { %547 = vrot.lane.b32.xlu0 %v1739_v13, %s1824_s3 }
 0x764   :  { %v1741_v14 = vpop.eup %1740 }
 0x765   :  { %571 = vrot.lane.b32.xlu1 %v1741_v14, %s1824_s3 }
 0x7d3   :  { %v548_v15 = vpop.permute.xlu0 %547 }
 0x7d4   :  { %v2055_v16 = vmul.f32 %v1735_v60, %v548_v15  ;;  %v1479_v15 = vld [vmem:[%s2362_s1 + $0x6] sm:$0x3] }
 0x7d6   :  { %v589_v17 = vpack.c.bf16 %v2055_v16, %v2055_v16 }
 0x7d7   :  { %v572_v18 = vpop.permute.xlu1 %571 }
 0x7d8   :  { %v2059_v19 = vmul.f32 %v1737_v63, %v572_v18  ;;  %591 = vrot.lane.b32.xlu0 %v589_v17, %s1825_s28 }
 0x7da   :  { %v639_v20 = vpack.c.bf16 %v2059_v19, %v2059_v19 }
 0x7dc   :  { %641 = vrot.lane.b32.xlu1 %v639_v20, %s1825_s28 }
 0x84a   :  { %v592_v21 = vpop.permute.xlu0 %591 }
 0x84b   :  { %1610 = vmatmul.mubr.msk.bf16.vlgmr.msra.gmra.mrb[12].mxu0 %vm95_vm2, %v592_v21 }
 0x84c   :  { %1622 = vmatpush3.bf16.msra.mxu0 %v1871_v1  ;;  %1625 = vmatprep.mubr.msk.bf16.mxu0 %vm1823_vm1, %v1822_v0 }
 0x84d   :  { %1623 = vmatprep.subr.bf16.mxu0 %v1822_v0 }
 0x84e   :  { %v642_v22 = vpop.permute.xlu1 %641 }
 0x84f   :  { %1618 = vmatmul.mubr.msk.bf16.vlgmr.msra.gmra.mrb[12].mxu1 %vm95_vm2, %v642_v22 }
 0x850   :  { %1630 = vmatpush3.bf16.msra.mxu1 %v1897_v2  ;;  %1624 = vmatpush3.bf16.msra.mxu0 %v1907_v3 }
 0x851   :  { %1631 = vmatprep.subr.bf16.mxu1 %v1822_v0  ;;  %1633 = vmatprep.mubr.msk.bf16.mxu1 %vm1823_vm1, %v1822_v0 }
 0x852   :  { %1637 = vmatprep.subr.bf16.mxu0 %v1822_v0 }
 0x854   :  { %1632 = vmatpush3.bf16.msra.mxu1 %v1914_v4 }
 0x855   :  { %1645 = vmatprep.subr.bf16.mxu1 %v1822_v0 }
 0x91e   :  { %v630_v24 = vpop.f32.mrb[12].mxu0 }
 0x91f   :  { %v636_v25 = vadd.f32 %v1469_v23, %v630_v24  ;;  %v1611_v26 = vpop.f32.mrb[13].mxu0 }
 0x920   :  { %v633_v27 = vpop.f32.mrb[14].mxu0 }
 0x921   :  { %1742 = vtanh.f32 %v636_v25  ;;  %v1612_v29 = vpop.f32.mrb[15].mxu0  ;;  %v1473_v39 = vmul.f32 -1.442695, %v636_v25 }
 0x922   :  { %v680_v30 = vpop.f32.mrb[12].mxu1 }
 0x923   :  { %v686_v32 = vadd.f32 %v1471_v28, %v680_v30  ;;  %v1619_v33 = vpop.f32.mrb[13].mxu1 }
 0x924   :  { %v683_v35 = vpop.f32.mrb[14].mxu1 }
 0x925   :  { %1744 = vtanh.f32 %v686_v32  ;;  %v1620_v36 = vpop.f32.mrb[15].mxu1  ;;  %v1474_v40 = vmul.f32 -1.442695, %v686_v32 }
 0x926   :  { %1746 = vpow2.f32 %v1473_v39 }
 0x927   :  { %1748 = vpow2.f32 %v1474_v40 }
 0x92b   :  { %v1743_v37 = vpop.eup %1742 }
 0x92c   :  { %696 = vrot.lane.b32.xlu0 %v1743_v37, %s1824_s3 }
 0x92f   :  { %v1745_v38 = vpop.eup %1744 }
 0x930   :  { %720 = vrot.lane.b32.xlu1 %v1745_v38, %s1824_s3  ;;  %v1747_v41 = vpop.eup %1746 }
 0x931   :  { %v690_v42 = vadd.f32 1.0, %v1747_v41  ;;  %v1749_v43 = vpop.eup %1748 }
 0x932   :  { %v714_v44 = vadd.f32 1.0, %v1749_v43 }
 0x933   :  { %1750 = vrcp.f32 %v690_v42 }
 0x934   :  { %1752 = vrcp.f32 %v714_v44 }
 0x93d   :  { %v1751_v45 = vpop.eup %1750 }
 0x93e   :  { %v1753_v49 = vpop.eup %1752  ;;  %v694_v53 = vmul.f32 %v1751_v45, %v2046_v9 }
 0x93f   :  { %v718_v56 = vmul.f32 %v1753_v49, %v2050_v12 }
 0x99e   :  { %v697_v46 = vpop.permute.xlu0 %696 }
 0x99f   :  { %v699_v47 = vmul.f32 %v1751_v45, %v697_v46 }
 0x9a1   :  { %701 = vrot.lane.b32.xlu0 %v699_v47, %s1824_s3 }
 0x9a2   :  { %v721_v50 = vpop.permute.xlu1 %720 }
 0x9a3   :  { %v723_v52 = vmul.f32 %v1753_v49, %v721_v50 }
 0x9a5   :  { %725 = vrot.lane.b32.xlu1 %v723_v52, %s1824_s3 }
 0xa13   :  { %v702_v54 = vpop.permute.xlu0 %701 }
 0xa14   :  { %v2090_v55 = vadd.f32 %v702_v54, %v694_v53 }
 0xa16   :  { %1754 = vtanh.f32 %v2090_v55 }
 0xa17   :  { %v726_v57 = vpop.permute.xlu1 %725 }
 0xa18   :  { %v2094_v58 = vadd.f32 %v726_v57, %v718_v56 }
 0xa1a   :  { %1756 = vtanh.f32 %v2094_v58 }
 0xa20   :  { %v1755_v59 = vpop.eup %1754 }
 0xa21   :  { %707 = vrot.lane.b32.xlu0 %v1755_v59, %s1824_s3 }
 0xa24   :  { %v1757_v60 = vpop.eup %1756 }
 0xa25   :  { %731 = vrot.lane.b32.xlu1 %v1757_v60, %s1824_s3 }
 0xa93   :  { %v708_v61 = vpop.permute.xlu0 %707 }
 0xa94   :  { %v2099_v62 = vmul.f32 %v1751_v45, %v708_v61 }
 0xa96   :  { %v749_v63 = vpack.c.bf16 %v2099_v62, %v2099_v62 }
 0xa97   :  { %v732_v5 = vpop.permute.xlu1 %731 }
 0xa98   :  { %v2103_v6 = vmul.f32 %v1753_v49, %v732_v5  ;;  %751 = vrot.lane.b32.xlu0 %v749_v63, %s1825_s28  ;;  %v1487_v5 = vld [vmem:[%s2362_s1 + $0x4] sm:$0x3] }
 0xa9a   :  { %v799_v7 = vpack.c.bf16 %v2103_v6, %v2103_v6 }
 0xa9c   :  { %801 = vrot.lane.b32.xlu1 %v799_v7, %s1825_s28 }
 0xb0a   :  { %v752_v8 = vpop.permute.xlu0 %751 }
 0xb0b   :  { %1626 = vmatmul.mubr.msk.bf16.vlgmr.msra.gmra.mrb[16].mxu0 %vm95_vm2, %v752_v8 }
 0xb0c   :  { %1638 = vmatpush3.bf16.msra.mxu0 %v1871_v1  ;;  %1641 = vmatprep.mubr.msk.bf16.mxu0 %vm1823_vm1, %v1822_v0 }
 0xb0d   :  { %1639 = vmatprep.subr.bf16.mxu0 %v1822_v0 }
 0xb0e   :  { %v802_v9 = vpop.permute.xlu1 %801 }
 0xb0f   :  { %1634 = vmatmul.mubr.msk.bf16.vlgmr.msra.gmra.mrb[16].mxu1 %vm95_vm2, %v802_v9 }
 0xb10   :  { %1646 = vmatpush3.bf16.msra.mxu1 %v1897_v2  ;;  %1640 = vmatpush3.bf16.msra.mxu0 %v1907_v3 }
 0xb11   :  { %1647 = vmatprep.subr.bf16.mxu1 %v1822_v0  ;;  %1649 = vmatprep.mubr.msk.bf16.mxu1 %vm1823_vm1, %v1822_v0 }
 0xb12   :  { %1653 = vmatprep.subr.bf16.mxu0 %v1822_v0 }
 0xb14   :  { %1648 = vmatpush3.bf16.msra.mxu1 %v1914_v4 }
 0xb15   :  { %1661 = vmatprep.subr.bf16.mxu1 %v1822_v0 }
 0xbde   :  { %v790_v11 = vpop.f32.mrb[16].mxu0 }
 0xbdf   :  { %v796_v12 = vadd.f32 %v1477_v10, %v790_v11  ;;  %v1627_v13 = vpop.f32.mrb[17].mxu0 }
 0xbe0   :  { %v793_v14 = vpop.f32.mrb[18].mxu0 }
 0xbe1   :  { %1758 = vtanh.f32 %v796_v12  ;;  %v1628_v17 = vpop.f32.mrb[19].mxu0  ;;  %v1481_v26 = vmul.f32 -1.442695, %v796_v12 }
 0xbe2   :  { %v840_v18 = vpop.f32.mrb[16].mxu1 }
 0xbe3   :  { %v846_v20 = vadd.f32 %v1479_v15, %v840_v18  ;;  %v1635_v21 = vpop.f32.mrb[17].mxu1 }
 0xbe4   :  { %v843_v22 = vpop.f32.mrb[18].mxu1 }
 0xbe5   :  { %1760 = vtanh.f32 %v846_v20  ;;  %v1636_v23 = vpop.f32.mrb[19].mxu1  ;;  %v1482_v27 = vmul.f32 -1.442695, %v846_v20 }
 0xbe6   :  { %1762 = vpow2.f32 %v1481_v26 }
 0xbe7   :  { %1764 = vpow2.f32 %v1482_v27 }
 0xbeb   :  { %v1759_v24 = vpop.eup %1758 }
 0xbec   :  { %856 = vrot.lane.b32.xlu0 %v1759_v24, %s1824_s3 }
 0xbef   :  { %v1761_v25 = vpop.eup %1760 }
 0xbf0   :  { %880 = vrot.lane.b32.xlu1 %v1761_v25, %s1824_s3  ;;  %v1763_v28 = vpop.eup %1762 }
 0xbf1   :  { %v850_v29 = vadd.f32 1.0, %v1763_v28  ;;  %v1765_v30 = vpop.eup %1764 }
 0xbf2   :  { %v874_v32 = vadd.f32 1.0, %v1765_v30 }
 0xbf3   :  { %1766 = vrcp.f32 %v850_v29 }
 0xbf4   :  { %1768 = vrcp.f32 %v874_v32 }
 0xbfd   :  { %v1767_v33 = vpop.eup %1766 }
 0xbfe   :  { %v1769_v37 = vpop.eup %1768  ;;  %v854_v40 = vmul.f32 %v1767_v33, %v2090_v55 }
 0xbff   :  { %v878_v43 = vmul.f32 %v1769_v37, %v2094_v58  ;;  %v1485_v58 = vld [vmem:[%s2361_s0 + $0xa] sm:$0x3] }
 0xc5e   :  { %v857_v35 = vpop.permute.xlu0 %856 }
 0xc5f   :  { %v859_v36 = vmul.f32 %v1767_v33, %v857_v35 }
 0xc61   :  { %861 = vrot.lane.b32.xlu0 %v859_v36, %s1824_s3 }
 0xc62   :  { %v881_v38 = vpop.permute.xlu1 %880 }
 0xc63   :  { %v883_v39 = vmul.f32 %v1769_v37, %v881_v38 }
 0xc65   :  { %885 = vrot.lane.b32.xlu1 %v883_v39, %s1824_s3 }
 0xcd3   :  { %v862_v41 = vpop.permute.xlu0 %861 }
 0xcd4   :  { %v2134_v42 = vadd.f32 %v862_v41, %v854_v40 }
 0xcd6   :  { %1770 = vtanh.f32 %v2134_v42 }
 0xcd7   :  { %v886_v44 = vpop.permute.xlu1 %885 }
 0xcd8   :  { %v2138_v45 = vadd.f32 %v886_v44, %v878_v43 }
 0xcda   :  { %1772 = vtanh.f32 %v2138_v45 }
 0xce0   :  { %v1771_v46 = vpop.eup %1770 }
 0xce1   :  { %867 = vrot.lane.b32.xlu0 %v1771_v46, %s1824_s3 }
 0xce4   :  { %v1773_v47 = vpop.eup %1772 }
 0xce5   :  { %891 = vrot.lane.b32.xlu1 %v1773_v47, %s1824_s3 }
 0xd53   :  { %v868_v49 = vpop.permute.xlu0 %867 }
 0xd54   :  { %v2143_v50 = vmul.f32 %v1767_v33, %v868_v49 }
 0xd56   :  { %v909_v52 = vpack.c.bf16 %v2143_v50, %v2143_v50 }
 0xd57   :  { %v892_v53 = vpop.permute.xlu1 %891 }
 0xd58   :  { %v2147_v54 = vmul.f32 %v1769_v37, %v892_v53  ;;  %911 = vrot.lane.b32.xlu0 %v909_v52, %s1825_s28 }
 0xd5a   :  { %v959_v55 = vpack.c.bf16 %v2147_v54, %v2147_v54 }
 0xd5c   :  { %961 = vrot.lane.b32.xlu1 %v959_v55, %s1825_s28 }
 0xdca   :  { %v912_v56 = vpop.permute.xlu0 %911 }
 0xdcb   :  { %1642 = vmatmul.mubr.msk.bf16.vlgmr.msra.gmra.mrb[20].mxu0 %vm95_vm2, %v912_v56 }
 0xdcc   :  { %1654 = vmatpush3.bf16.msra.mxu0 %v1871_v1  ;;  %1657 = vmatprep.mubr.msk.bf16.mxu0 %vm1823_vm1, %v1822_v0 }
 0xdcd   :  { %1655 = vmatprep.subr.bf16.mxu0 %v1822_v0 }
 0xdce   :  { %v962_v57 = vpop.permute.xlu1 %961 }
 0xdcf   :  { %1650 = vmatmul.mubr.msk.bf16.vlgmr.msra.gmra.mrb[20].mxu1 %vm95_vm2, %v962_v57 }
 0xdd0   :  { %1662 = vmatpush3.bf16.msra.mxu1 %v1897_v2  ;;  %1656 = vmatpush3.bf16.msra.mxu0 %v1907_v3 }
 0xdd1   :  { %1663 = vmatprep.subr.bf16.mxu1 %v1822_v0  ;;  %1665 = vmatprep.mubr.msk.bf16.mxu1 %vm1823_vm1, %v1822_v0 }
 0xdd2   :  { %1669 = vmatprep.subr.bf16.mxu0 %v1822_v0 }
 0xdd4   :  { %1664 = vmatpush3.bf16.msra.mxu1 %v1914_v4 }
 0xdd5   :  { %1677 = vmatprep.subr.bf16.mxu1 %v1822_v0 }
 0xe9e   :  { %v950_v59 = vpop.f32.mrb[20].mxu0 }
 0xe9f   :  { %v956_v60 = vadd.f32 %v1485_v58, %v950_v59  ;;  %v1643_v61 = vpop.f32.mrb[21].mxu0 }
 0xea0   :  { %v953_v63 = vpop.f32.mrb[22].mxu0 }
 0xea1   :  { %1774 = vtanh.f32 %v956_v60  ;;  %v1644_v7 = vpop.f32.mrb[23].mxu0  ;;  %v1489_v15 = vmul.f32 -1.442695, %v956_v60 }
 0xea2   :  { %v1000_v8 = vpop.f32.mrb[20].mxu1 }
 0xea3   :  { %v1006_v9 = vadd.f32 %v1487_v5, %v1000_v8  ;;  %v1651_v10 = vpop.f32.mrb[21].mxu1 }
 0xea4   :  { %v1003_v11 = vpop.f32.mrb[22].mxu1 }
 0xea5   :  { %1776 = vtanh.f32 %v1006_v9  ;;  %v1652_v12 = vpop.f32.mrb[23].mxu1  ;;  %v1490_v17 = vmul.f32 -1.442695, %v1006_v9 }
 0xea6   :  { %1778 = vpow2.f32 %v1489_v15 }
 0xea7   :  { %1780 = vpow2.f32 %v1490_v17 }
 0xeab   :  { %v1775_v13 = vpop.eup %1774 }
 0xeac   :  { %1016 = vrot.lane.b32.xlu0 %v1775_v13, %s1824_s3 }
 0xeaf   :  { %v1777_v14 = vpop.eup %1776 }
 0xeb0   :  { %1040 = vrot.lane.b32.xlu1 %v1777_v14, %s1824_s3  ;;  %v1779_v18 = vpop.eup %1778 }
 0xeb1   :  { %v1010_v20 = vadd.f32 1.0, %v1779_v18  ;;  %v1781_v21 = vpop.eup %1780 }
 0xeb2   :  { %v1034_v22 = vadd.f32 1.0, %v1781_v21 }
 0xeb3   :  { %1782 = vrcp.f32 %v1010_v20 }
 0xeb4   :  { %1784 = vrcp.f32 %v1034_v22 }
 0xebd   :  { %v1783_v23 = vpop.eup %1782 }
 0xebe   :  { %v1785_v26 = vpop.eup %1784  ;;  %v1014_v29 = vmul.f32 %v1783_v23, %v2134_v42 }
 0xebf   :  { %v1038_v33 = vmul.f32 %v1785_v26, %v2138_v45 }
 0xf1e   :  { %v1017_v24 = vpop.permute.xlu0 %1016 }
 0xf1f   :  { %v1019_v25 = vmul.f32 %v1783_v23, %v1017_v24 }
 0xf21   :  { %1021 = vrot.lane.b32.xlu0 %v1019_v25, %s1824_s3 }
 0xf22   :  { %v1041_v27 = vpop.permute.xlu1 %1040 }
 0xf23   :  { %v1043_v28 = vmul.f32 %v1785_v26, %v1041_v27 }
 0xf25   :  { %1045 = vrot.lane.b32.xlu1 %v1043_v28, %s1824_s3 }
 0xf93   :  { %v1022_v30 = vpop.permute.xlu0 %1021 }
 0xf94   :  { %v2178_v32 = vadd.f32 %v1022_v30, %v1014_v29 }
 0xf96   :  { %1786 = vtanh.f32 %v2178_v32 }
 0xf97   :  { %v1046_v35 = vpop.permute.xlu1 %1045 }
 0xf98   :  { %v2182_v36 = vadd.f32 %v1046_v35, %v1038_v33  ;;  %v1501_v35 = vld [vmem:[%s2361_s0 + $0xe] sm:$0x3] }
 0xf9a   :  { %1788 = vtanh.f32 %v2182_v36 }
 0xfa0   :  { %v1787_v37 = vpop.eup %1786 }
 0xfa1   :  { %1027 = vrot.lane.b32.xlu0 %v1787_v37, %s1824_s3 }
 0xfa4   :  { %v1789_v38 = vpop.eup %1788 }
 0xfa5   :  { %1051 = vrot.lane.b32.xlu1 %v1789_v38, %s1824_s3 }
0x1013   :  { %v1028_v39 = vpop.permute.xlu0 %1027 }
0x1014   :  { %v2187_v40 = vmul.f32 %v1783_v23, %v1028_v39 }
0x1016   :  { %v1069_v41 = vpack.c.bf16 %v2187_v40, %v2187_v40 }
0x1017   :  { %v1052_v42 = vpop.permute.xlu1 %1051 }
0x1018   :  { %v2191_v43 = vmul.f32 %v1785_v26, %v1052_v42  ;;  %1071 = vrot.lane.b32.xlu0 %v1069_v41, %s1825_s28  ;;  %v1277_v41 = vld [vmem:[%s2362_s1] sm:$0x3] }
0x101a   :  { %v1119_v44 = vpack.c.bf16 %v2191_v43, %v2191_v43 }
0x101c   :  { %1121 = vrot.lane.b32.xlu1 %v1119_v44, %s1825_s28 }
0x108a   :  { %v1072_v45 = vpop.permute.xlu0 %1071 }
0x108b   :  { %1658 = vmatmul.mubr.msk.bf16.vlgmr.msra.gmra.mrb[24].mxu0 %vm95_vm2, %v1072_v45 }
0x108c   :  { %1670 = vmatpush3.bf16.msra.mxu0 %v1871_v1  ;;  %1673 = vmatprep.mubr.msk.bf16.mxu0 %vm1823_vm1, %v1822_v0  ;;  %v1493_v1 = vld [vmem:[%s2361_s0 + $0xc] sm:$0x3] }
0x108d   :  { %1671 = vmatprep.subr.bf16.mxu0 %v1822_v0 }
0x108e   :  { %v1122_v46 = vpop.permute.xlu1 %1121 }
0x108f   :  { %1666 = vmatmul.mubr.msk.bf16.vlgmr.msra.gmra.mrb[24].mxu1 %vm95_vm2, %v1122_v46 }
0x1090   :  { %1678 = vmatpush3.bf16.msra.mxu1 %v1897_v2  ;;  %1672 = vmatpush3.bf16.msra.mxu0 %v1907_v3  ;;  %v1495_v2 = vld [vmem:[%s2362_s1 + $0x2] sm:$0x3] }
0x1091   :  { %1679 = vmatprep.subr.bf16.mxu1 %v1822_v0  ;;  %1681 = vmatprep.mubr.msk.bf16.mxu1 %vm1823_vm1, %v1822_v0 }
0x1094   :  { %1680 = vmatpush3.bf16.msra.mxu1 %v1914_v4 }
0x115e   :  { %v1110_v47 = vpop.f32.mrb[24].mxu0 }
0x115f   :  { %v1116_v49 = vadd.f32 %v1493_v1, %v1110_v47  ;;  %v1659_v52 = vpop.f32.mrb[25].mxu0 }
0x1160   :  { %v1113_v53 = vpop.f32.mrb[26].mxu0 }
0x1161   :  { %1790 = vtanh.f32 %v1116_v49  ;;  %v1660_v3 = vpop.f32.mrb[27].mxu0  ;;  %v1497_v60 = vmul.f32 -1.442695, %v1116_v49 }
0x1162   :  { %v1160_v55 = vpop.f32.mrb[24].mxu1 }
0x1163   :  { %v1166_v56 = vadd.f32 %v1495_v2, %v1160_v55  ;;  %v1667_v57 = vpop.f32.mrb[25].mxu1 }
0x1164   :  { %v1163_v0 = vpop.f32.mrb[26].mxu1 }
0x1165   :  { %1792 = vtanh.f32 %v1166_v56  ;;  %v1668_v4 = vpop.f32.mrb[27].mxu1  ;;  %v1498_v61 = vmul.f32 -1.442695, %v1166_v56 }
0x1166   :  { %1794 = vpow2.f32 %v1497_v60 }
0x1167   :  { %1796 = vpow2.f32 %v1498_v61 }
0x116b   :  { %v1791_v58 = vpop.eup %1790 }
0x116c   :  { %1176 = vrot.lane.b32.xlu0 %v1791_v58, %s1824_s3 }
0x116f   :  { %v1793_v59 = vpop.eup %1792 }
0x1170   :  { %1200 = vrot.lane.b32.xlu1 %v1793_v59, %s1824_s3  ;;  %v1795_v63 = vpop.eup %1794 }
0x1171   :  { %v1170_v5 = vadd.f32 1.0, %v1795_v63  ;;  %v1797_v7 = vpop.eup %1796 }
0x1172   :  { %v1194_v8 = vadd.f32 1.0, %v1797_v7 }
0x1173   :  { %1798 = vrcp.f32 %v1170_v5 }
0x1174   :  { %1800 = vrcp.f32 %v1194_v8 }
0x117d   :  { %v1799_v9 = vpop.eup %1798 }
0x117e   :  { %v1801_v12 = vpop.eup %1800  ;;  %v1174_v15 = vmul.f32 %v1799_v9, %v2178_v32 }
0x117f   :  { %v1198_v20 = vmul.f32 %v1801_v12, %v2182_v36 }
0x11de   :  { %v1177_v10 = vpop.permute.xlu0 %1176 }
0x11df   :  { %v1179_v11 = vmul.f32 %v1799_v9, %v1177_v10 }
0x11e1   :  { %1181 = vrot.lane.b32.xlu0 %v1179_v11, %s1824_s3 }
0x11e2   :  { %v1201_v13 = vpop.permute.xlu1 %1200 }
0x11e3   :  { %v1203_v14 = vmul.f32 %v1801_v12, %v1201_v13 }
0x11e5   :  { %1205 = vrot.lane.b32.xlu1 %v1203_v14, %s1824_s3 }
0x1253   :  { %v1182_v17 = vpop.permute.xlu0 %1181 }
0x1254   :  { %v1184_v18 = vadd.f32 %v1182_v17, %v1174_v15 }
0x1256   :  { %1802 = vtanh.f32 %v1184_v18 }
0x1257   :  { %v1206_v21 = vpop.permute.xlu1 %1205 }
0x1258   :  { %v1208_v22 = vadd.f32 %v1206_v21, %v1198_v20 }
0x125a   :  { %1804 = vtanh.f32 %v1208_v22 }
0x1260   :  { %v1803_v23 = vpop.eup %1802 }
0x1261   :  { %1187 = vrot.lane.b32.xlu0 %v1803_v23, %s1824_s3 }
0x1264   :  { %v1805_v24 = vpop.eup %1804 }
0x1265   :  { %1211 = vrot.lane.b32.xlu1 %v1805_v24, %s1824_s3 }
0x12d3   :  { %v1188_v25 = vpop.permute.xlu0 %1187 }
0x12d4   :  { %v2223_v26 = vmul.f32 %v1799_v9, %v1188_v25 }
0x12d6   :  { %v1229_v27 = vpack.c.bf16 %v2223_v26, %v2223_v26 }
0x12d7   :  { %v1212_v28 = vpop.permute.xlu1 %1211 }
0x12d8   :  { %v2227_v29 = vmul.f32 %v1801_v12, %v1212_v28  ;;  %1231 = vrot.lane.b32.xlu0 %v1229_v27, %s1825_s28 }
0x12da   :  { %v1278_v30 = vpack.c.bf16 %v2227_v29, %v2227_v29 }
0x12dc   :  { %1280 = vrot.lane.b32.xlu1 %v1278_v30, %s1825_s28 }
0x134a   :  { %v1232_v32 = vpop.permute.xlu0 %1231 }
0x134b   :  { %1674 = vmatmul.mubr.msk.bf16.vlgmr.msra.gmra.mrb[28].mxu0 %vm95_vm2, %v1232_v32 }
0x134e   :  { %v1281_v33 = vpop.permute.xlu1 %1280 }
0x134f   :  { %1682 = vmatmul.mubr.msk.bf16.vlgmr.msra.gmra.mrb[28].mxu1 %vm95_vm2, %v1281_v33 }
0x141e   :  { %v1270_v36 = vpop.f32.mrb[28].mxu0 }
0x141f   :  { %v1276_v37 = vadd.f32 %v1501_v35, %v1270_v36  ;;  %v1675_v38 = vpop.f32.mrb[29].mxu0 }
0x1420   :  { %v1273_v39 = vpop.f32.mrb[30].mxu0 }
0x1421   :  { %1806 = vtanh.f32 %v1276_v37  ;;  %v1676_v42 = vpop.f32.mrb[31].mxu0  ;;  %v1504_v53 = vmul.f32 -1.442695, %v1276_v37 }
0x1422   :  { %v1319_v44 = vpop.f32.mrb[28].mxu1 }
0x1423   :  { %v1325_v45 = vadd.f32 %v1319_v44, %v1277_v41  ;;  %v1683_v46 = vpop.f32.mrb[29].mxu1 }
0x1424   :  { %v1322_v1 = vpop.f32.mrb[30].mxu1 }
0x1425   :  { %1808 = vtanh.f32 %v1325_v45  ;;  %v1684_v47 = vpop.f32.mrb[31].mxu1  ;;  %v1505_v2 = vmul.f32 -1.442695, %v1325_v45 }
0x1426   :  { %1810 = vpow2.f32 %v1504_v53 }
0x1427   :  { %1812 = vpow2.f32 %v1505_v2 }
0x142b   :  { %v1807_v49 = vpop.eup %1806 }
0x142c   :  { %1335 = vrot.lane.b32.xlu0 %v1807_v49, %s1824_s3 }
0x142f   :  { %v1809_v52 = vpop.eup %1808 }
0x1430   :  { %1359 = vrot.lane.b32.xlu1 %v1809_v52, %s1824_s3  ;;  %v1811_v3 = vpop.eup %1810 }
0x1431   :  { %v1329_v55 = vadd.f32 1.0, %v1811_v3  ;;  %v1813_v56 = vpop.eup %1812 }
0x1432   :  { %v1353_v57 = vadd.f32 1.0, %v1813_v56 }
0x1433   :  { %1814 = vrcp.f32 %v1329_v55 }
0x1434   :  { %1816 = vrcp.f32 %v1353_v57 }
0x143d   :  { %v1815_v0 = vpop.eup %1814 }
0x143e   :  { %v1817_v59 = vpop.eup %1816  ;;  %v1333_v63 = vmul.f32 %v1815_v0, %v1184_v18 }
0x143f   :  { %v1357_v8 = vmul.f32 %v1817_v59, %v1208_v22 }
0x149e   :  { %v1336_v4 = vpop.permute.xlu0 %1335 }
0x149f   :  { %v1338_v58 = vmul.f32 %v1815_v0, %v1336_v4 }
0x14a1   :  { %1340 = vrot.lane.b32.xlu0 %v1338_v58, %s1824_s3 }
0x14a2   :  { %v1360_v60 = vpop.permute.xlu1 %1359 }
0x14a3   :  { %v1362_v61 = vmul.f32 %v1817_v59, %v1360_v60 }
0x14a5   :  { %1364 = vrot.lane.b32.xlu1 %v1362_v61, %s1824_s3 }
0x1513   :  { %v1341_v5 = vpop.permute.xlu0 %1340 }
0x1514   :  { %v1343_v7 = vadd.f32 %v1341_v5, %v1333_v63 }
0x1516   :  { %1818 = vtanh.f32 %v1343_v7 }
0x1517   :  { %v1365_v9 = vpop.permute.xlu1 %1364 }
0x1518   :  { %v1367_v10 = vadd.f32 %v1365_v9, %v1357_v8 }
0x151a   :  { %1820 = vtanh.f32 %v1367_v10 }
0x1520   :  { %v1819_v11 = vpop.eup %1818 }
0x1521   :  { %1346 = vrot.lane.b32.xlu0 %v1819_v11, %s1824_s3 }
0x1524   :  { %v1821_v12 = vpop.eup %1820 }
0x1525   :  { %1370 = vrot.lane.b32.xlu1 %v1821_v12, %s1824_s3  ;;  %256 = vrot.lane.b32.xlu0 %v1967_v48, %s1825_s28  ;;  %s1826_s3 = smov 96  }
0x1529   :  { %262 = vrot.lane.b32.xlu1 %v1971_v51, %s1825_s28  ;;  %416 = vrot.lane.b32.xlu0 %v2011_v31, %s1825_s28 }
0x152d   :  { %422 = vrot.lane.b32.xlu1 %v2015_v34, %s1825_s28  ;;  %576 = vrot.lane.b32.xlu0 %v2055_v16, %s1825_s28 }
0x1531   :  { %582 = vrot.lane.b32.xlu1 %v2059_v19, %s1825_s28  ;;  %736 = vrot.lane.b32.xlu0 %v2099_v62, %s1825_s28 }
0x1535   :  { %742 = vrot.lane.b32.xlu1 %v2103_v6, %s1825_s28  ;;  %896 = vrot.lane.b32.xlu0 %v2143_v50, %s1825_s28 }
0x1539   :  { %902 = vrot.lane.b32.xlu1 %v2147_v54, %s1825_s28  ;;  %1056 = vrot.lane.b32.xlu0 %v2187_v40, %s1825_s28 }
0x153d   :  { %1062 = vrot.lane.b32.xlu1 %v2191_v43, %s1825_s28  ;;  %1216 = vrot.lane.b32.xlu0 %v2223_v26, %s1825_s28 }
0x1541   :  { %1222 = vrot.lane.b32.xlu1 %v2227_v29, %s1825_s28 }
0x1593   :  { %v1347_v48 = vpop.permute.xlu0 %1346 }
0x1594   :  { %v1349_v51 = vmul.f32 %v1815_v0, %v1347_v48 }
0x1596   :  { %1375 = vrot.lane.b32.xlu0 %v1349_v51, %s1825_s28 }
0x1597   :  { %v1371_v31 = vpop.permute.xlu1 %1370  ;;  %v257_v34 = vpop.permute.xlu0 %256 }
0x1598   :  { %v1373_v16 = vmul.f32 %v1817_v59, %v1371_v31  ;;  %260 = vst.msk [vmem:[%s2363_s4] sm:$0x3] %vm62_vm0, %v257_v34 }
0x159a   :  { %1381 = vrot.lane.b32.xlu1 %v1373_v16, %s1825_s28  ;;  %1387 = vrot.lane.b32.xlu0 %v1343_v7, %s1826_s3 }
0x159b   :  { %v263_v19 = vpop.permute.xlu1 %262  ;;  %v417_v62 = vpop.permute.xlu0 %416 }
0x159c   :  { %1452 = vst.msk [vmem:[%s2364_s5 + $0xe] sm:$0x3] %vm62_vm0, %v263_v19  ;;  %1459 = vst.msk [vmem:[%s2363_s4 + $0x2] sm:$0x3] %vm62_vm0, %v417_v62 }
0x159e   :  { %1393 = vrot.lane.b32.xlu1 %v1367_v10, %s1826_s3 }
0x159f   :  { %v423_v6 = vpop.permute.xlu1 %422  ;;  %v577_v50 = vpop.permute.xlu0 %576 }
0x15a0   :  { %1460 = vst.msk [vmem:[%s2364_s5 + $0xc] sm:$0x3] %vm62_vm0, %v423_v6  ;;  %1467 = vst.msk [vmem:[%s2363_s4 + $0x4] sm:$0x3] %vm62_vm0, %v577_v50 }
0x15a3   :  { %v583_v54 = vpop.permute.xlu1 %582  ;;  %v737_v40 = vpop.permute.xlu0 %736 }
0x15a4   :  { %1468 = vst.msk [vmem:[%s2364_s5 + $0xa] sm:$0x3] %vm62_vm0, %v583_v54  ;;  %1475 = vst.msk [vmem:[%s2363_s4 + $0x6] sm:$0x3] %vm62_vm0, %v737_v40 }
0x15a7   :  { %v743_v43 = vpop.permute.xlu1 %742  ;;  %v897_v13 = vpop.permute.xlu0 %896 }
0x15a8   :  { %1476 = vst.msk [vmem:[%s2364_s5 + $0x8] sm:$0x3] %vm62_vm0, %v743_v43  ;;  %1483 = vst.msk [vmem:[%s2363_s4 + $0x8] sm:$0x3] %vm62_vm0, %v897_v13 }
0x15ab   :  { %v903_v14 = vpop.permute.xlu1 %902  ;;  %v1057_v15 = vpop.permute.xlu0 %1056 }
0x15ac   :  { %1484 = vst.msk [vmem:[%s2364_s5 + $0x6] sm:$0x3] %vm62_vm0, %v903_v14  ;;  %1491 = vst.msk [vmem:[%s2363_s4 + $0xa] sm:$0x3] %vm62_vm0, %v1057_v15 }
0x15af   :  { %v1063_v17 = vpop.permute.xlu1 %1062  ;;  %v1217_v18 = vpop.permute.xlu0 %1216 }
0x15b0   :  { %1492 = vst.msk [vmem:[%s2364_s5 + $0x4] sm:$0x3] %vm62_vm0, %v1063_v17  ;;  %1499 = vst.msk [vmem:[%s2363_s4 + $0xc] sm:$0x3] %vm62_vm0, %v1217_v18 }
0x15b3   :  { %v1223_v20 = vpop.permute.xlu1 %1222 }
0x15b4   :  { %1500 = vst.msk [vmem:[%s2364_s5 + $0x2] sm:$0x3] %vm62_vm0, %v1223_v20 }
0x1608   :  { %v1376_v21 = vpop.permute.xlu0 %1375 }
0x1609   :  { %1506 = vst.msk [vmem:[%s2363_s4 + $0xe] sm:$0x3] %vm62_vm0, %v1376_v21  ;;  %1385 = vst.msk [vmem:[%s2359_s6] sm:$0x3] %vm62_vm0, %v1376_v21 }
0x160c   :  { %v1382_v22 = vpop.permute.xlu1 %1381  ;;  %v1388_v23 = vpop.permute.xlu0 %1387 }
0x160d   :  { %1384 = vst.msk [vmem:[%s2364_s5] sm:$0x3] %vm62_vm0, %v1382_v22  ;;  %1507 = vst.msk [vmem:[%s2359_s6 + $0x2] sm:$0x3] %vm62_vm0, %v1382_v22 }
0x160e   :  { %1390 = vst.msk [vmem:[%s2360_s7] sm:$0x3] %vm62_vm0, %v1388_v23 }
0x1610   :  { %v1394_v24 = vpop.permute.xlu1 %1393 }
0x1611   :  { %1508 = vst.msk [vmem:[%s2360_s7 + $0x2] sm:$0x3] %vm62_vm0, %v1394_v24 }

</bundles_post_ra>
